<compile_context>
chip_gen: v7x
topology: tpu7x:2x2x1
jax: 0.10.0
libtpu: 0.0.40
codegen_flags: <defaults>
</compile_context>

<pallas_src>
import functools
import math

import numpy as np
import jax
import jax.numpy as jnp
from jax.experimental import pallas as pl
from jax.experimental.pallas import tpu as pltpu

# ----------------------- small synthetic configuration -----------------------
IMG = 16
PATCH = 8
IN_CHANS = 3
NUM_CLASSES = 10
EMBED_DIM = 32
DEPTHS = (1, 1)
NUM_HEADS = (1, 2)
POOL_STRIDE = ((1, 2, 2), (2, 2, 2))
MLP_RATIO = 4.0
NUM_FRAMES = 8
BATCH = 2


# ------------------------------ in-kernel helpers ----------------------------
def _ln(x, g, b):
    """f32 LayerNorm over last dim (g, b broadcast from (1, D))."""
    mu = jnp.mean(x, axis=-1, keepdims=True)
    var = jnp.mean((x - mu) ** 2, axis=-1, keepdims=True)
    return (x - mu) * jax.lax.rsqrt(var + 1e-5) * g + b


# ------------------------------ Pallas kernels -------------------------------
def _patch_embed_kernel(p_ref, w_ref, b_ref, pos_ref, o_ref):
    """(im2col patches) @ W  + bias + pos_embed, one batch element per step."""
    acc = jnp.dot(p_ref[0], w_ref[...], preferred_element_type=jnp.float32)
    o_ref[0] = (acc + b_ref[...] + pos_ref[...]).astype(o_ref.dtype)


def _block_kernel(*refs, num_heads, has_pool, has_proj):
    """Fused MultiScaleBlock: LN1->QKV->(pool)->attn->proj->res->LN2->MLP->skip."""
    refs = list(refs)
    o_ref = refs.pop()
    it = iter(refs)
    x_ref = next(it)
    pool_ref = next(it) if has_pool else None
    n1g, n1b = next(it), next(it)
    qkvw, qkvb = next(it), next(it)
    projw, projb = next(it), next(it)
    n2g, n2b = next(it), next(it)
    fc1w, fc1b = next(it), next(it)
    fc2w, fc2b = next(it), next(it)
    if has_proj:
        prw, prb = next(it), next(it)

    x = x_ref[0].astype(jnp.float32)               # (N, dim)
    dim = x.shape[-1]

    # --- LN1 + QKV projection (bf16 matmul, f32 accumulate) ---
    xn = _ln(x, n1g[...], n1b[...])
    qkv = jnp.dot(xn.astype(jnp.bfloat16), qkvw[...],
                  preferred_element_type=jnp.float32) + qkvb[...]
    q = qkv[:, 0 * dim:1 * dim]                    # zero-cost static slices
    k = qkv[:, 1 * dim:2 * dim]
    v = qkv[:, 2 * dim:3 * dim]

    # --- avg-pool q and residual over the (T,H,W) grid (f32 matmul) ---
    if has_pool:
        pm = pool_ref[...]
        q = jnp.dot(pm, q, preferred_element_type=jnp.float32)
        x_res = jnp.dot(pm, x, preferred_element_type=jnp.float32)
    else:
        x_res = x

    # --- multi-head attention (static per-head loop, f32 softmax) ---
    hd = dim // num_heads
    scale = 1.0 / math.sqrt(hd)
    head_outs = []
    for h in range(num_heads):
        qh = q[:, h * hd:(h + 1) * hd].astype(jnp.bfloat16)
        kh = k[:, h * hd:(h + 1) * hd].astype(jnp.bfloat16)
        vh = v[:, h * hd:(h + 1) * hd].astype(jnp.bfloat16)
        s = jax.lax.dot_general(qh, kh, (((1,), (1,)), ((), ())),
                                preferred_element_type=jnp.float32) * scale
        s = s - jnp.max(s, axis=-1, keepdims=True)
        p = jnp.exp(s)
        p = p * pl.reciprocal(jnp.sum(p, axis=-1, keepdims=True), approx=True)
        head_outs.append(jnp.dot(p.astype(jnp.bfloat16), vh,
                                 preferred_element_type=jnp.float32))
    attn = head_outs[0] if num_heads == 1 else jnp.concatenate(head_outs, axis=-1)
    attn = jnp.dot(attn.astype(jnp.bfloat16), projw[...],
                   preferred_element_type=jnp.float32) + projb[...]

    x1 = x_res + attn

    # --- LN2 + MLP (GELU in f32) + (projected) skip ---
    xn2 = _ln(x1, n2g[...], n2b[...])
    h1 = jnp.dot(xn2.astype(jnp.bfloat16), fc1w[...],
                 preferred_element_type=jnp.float32) + fc1b[...]
    # tanh-approx GELU (exact-erf GELU of nn.GELU differs by <1e-3)
    h1 = jax.nn.gelu(h1, approximate=True)
    mlp = jnp.dot(h1.astype(jnp.bfloat16), fc2w[...],
                  preferred_element_type=jnp.float32) + fc2b[...]
    if has_proj:
        skip = jnp.dot(xn2.astype(jnp.bfloat16), prw[...],
                       preferred_element_type=jnp.float32) + prb[...]
    else:
        skip = x1
    o_ref[0] = (skip + mlp).astype(o_ref.dtype)


def _head_kernel(x_ref, g_ref, b_ref, w_ref, hb_ref, o_ref):
    """Fused final LayerNorm + token mean + classifier head."""
    x = x_ref[0].astype(jnp.float32)               # (N, D)
    xn = _ln(x, g_ref[...], b_ref[...])
    pooled = jnp.mean(xn, axis=0, keepdims=True)   # (1, D)
    o_ref[0] = (jnp.dot(pooled.astype(jnp.bfloat16), w_ref[...],
                        preferred_element_type=jnp.float32)
                + hb_ref[...]).astype(o_ref.dtype)


# ------------------------------ model pieces ---------------------------------
def patch_embed(x, w, b, pos, patch_size):
    """Conv3d(in, out, k=(3,P,P), s=(2,P,P), pad=(1,0,0)) via im2col + fused Pallas matmul."""
    B, Cin, T, H, W = x.shape
    Cout = w.shape[0]
    P = patch_size
    Tp = (T + 2 - 3) // 2 + 1
    Hp, Wp = H // P, W // P
    N = Tp * Hp * Wp
    K = Cin * 3 * P * P

    x_pad = jnp.pad(x, ((0, 0), (0, 0), (1, 1), (0, 0), (0, 0)))
    windows = jnp.stack([x_pad[:, :, 2 * t:2 * t + 3] for t in range(Tp)], axis=2)
    windows = windows.reshape(B, Cin, Tp, 3, Hp, P, Wp, P)
    patches = windows.transpose(0, 2, 4, 6, 1, 3, 5, 7).reshape(B, N, K)
    w_flat = w.reshape(Cout, K).T                  # (K, Cout), (cin,kt,kh,kw) order

    out = pl.pallas_call(
        _patch_embed_kernel,
        out_shape=jax.ShapeDtypeStruct((B, N, Cout), jnp.float32),
        grid=(B,),
        in_specs=[
            pl.BlockSpec((1, N, K), lambda i: (i, 0, 0)),
            pl.BlockSpec((K, Cout), lambda i: (0, 0)),
            pl.BlockSpec((1, Cout), lambda i: (0, 0)),
            pl.BlockSpec((N, Cout), lambda i: (0, 0)),
        ],
        out_specs=pl.BlockSpec((1, N, Cout), lambda i: (i, 0, 0)),
        compiler_params=pltpu.CompilerParams(dimension_semantics=("parallel",)),
    )(patches.astype(jnp.bfloat16), w_flat.astype(jnp.bfloat16),
      b.reshape(1, Cout).astype(jnp.float32),
      pos.reshape(N, Cout).astype(jnp.float32))
    return out, (Tp, Hp, Wp)


def make_pool_matrix(thw, stride):
    """(Nq, N) avg-pool matrix over the flattened (T,H,W) token grid."""
    T, H, W = thw
    st, sh, sw = stride
    Tn, Hn, Wn = T // st, H // sh, W // sw
    m = np.zeros((Tn * Hn * Wn, T * H * W), np.float32)
    inv = 1.0 / (st * sh * sw)
    for t in range(Tn):
        for h in range(Hn):
            for w in range(Wn):
                oi = (t * Hn + h) * Wn + w
                for dt in range(st):
                    for dh in range(sh):
                        for dw in range(sw):
                            ii = ((t * st + dt) * H + (h * sh + dh)) * W + (w * sw + dw)
                            m[oi, ii] = inv
    return jnp.asarray(m)


def multiscale_block(x, thw, p, *, dim, dim_out, num_heads, stride):
    # TODO(synk): MultiScaleBlock source was not provided; standard MViT-v1 block used.
    B, N, _ = x.shape
    has_pool = tuple(stride) != (1, 1, 1)
    has_proj = dim != dim_out
    hidden = p["fc1_w"].shape[1]

    if has_pool:
        pool_mat = make_pool_matrix(thw, stride)
        thw_new = tuple(t // s for t, s in zip(thw, stride))
        Nq = pool_mat.shape[0]
    else:
        thw_new = thw
        Nq = N

    def wbf16(a):
        return a.astype(jnp.bfloat16)

    def row(a):
        return a.reshape(1, -1).astype(jnp.float32)

    inputs = [x.astype(jnp.float32)]
    in_specs = [pl.BlockSpec((1, N, dim), lambda i: (i, 0, 0))]
    if has_pool:
        inputs.append(pool_mat)
        in_specs.append(pl.BlockSpec((Nq, N), lambda i: (0, 0)))

    weights = [
        row(p["n1g"]), row(p["n1b"]),
        wbf16(p["qkv_w"]), row(p["qkv_b"]),
        wbf16(p["proj_w"]), row(p["proj_b"]),
        row(p["n2g"]), row(p["n2b"]),
        wbf16(p["fc1_w"]), row(p["fc1_b"]),
        wbf16(p["fc2_w"]), row(p["fc2_b"]),
    ]
    if has_proj:
        weights += [wbf16(p["pr_w"]), row(p["pr_b"])]
    for warr in weights:
        inputs.append(warr)
        in_specs.append(pl.BlockSpec(warr.shape, lambda i: (0, 0)))

    kern = functools.partial(_block_kernel, num_heads=num_heads,
                             has_pool=has_pool, has_proj=has_proj)
    out = pl.pallas_call(
        kern,
        out_shape=jax.ShapeDtypeStruct((B, Nq, dim_out), jnp.float32),
        grid=(B,),
        in_specs=in_specs,
        out_specs=pl.BlockSpec((1, Nq, dim_out), lambda i: (i, 0, 0)),
        compiler_params=pltpu.CompilerParams(dimension_semantics=("parallel",)),
    )(*inputs)
    return out, thw_new


def norm_mean_head(tokens, g, b, w, hb):
    B, N, D = tokens.shape
    C = w.shape[1]
    out = pl.pallas_call(
        _head_kernel,
        out_shape=jax.ShapeDtypeStruct((B, 1, C), jnp.float32),
        grid=(B,),
        in_specs=[
            pl.BlockSpec((1, N, D), lambda i: (i, 0, 0)),
            pl.BlockSpec((1, D), lambda i: (0, 0)),
            pl.BlockSpec((1, D), lambda i: (0, 0)),
            pl.BlockSpec((D, C), lambda i: (0, 0)),
            pl.BlockSpec((1, C), lambda i: (0, 0)),
        ],
        out_specs=pl.BlockSpec((1, 1, C), lambda i: (i, 0, 0)),
        compiler_params=pltpu.CompilerParams(dimension_semantics=("parallel",)),
    )(tokens.astype(jnp.float32), g.reshape(1, D).astype(jnp.float32),
      b.reshape(1, D).astype(jnp.float32), w.astype(jnp.bfloat16),
      hb.reshape(1, C).astype(jnp.float32))
    return out.reshape(B, C)


# ------------------------------ parameter init -------------------------------
def init_params(key):
    keys = iter(jax.random.split(key, 64))

    def tn(shape, std=0.02):
        return std * jax.random.truncated_normal(next(keys), -2.0, 2.0, shape, jnp.float32)

    params = {}
    params["patch_w"] = tn((EMBED_DIM, IN_CHANS, 3, PATCH, PATCH))
    params["patch_b"] = jnp.zeros((EMBED_DIM,), jnp.float32)
    num_patches = (IMG // PATCH) ** 2
    num_tpatch = NUM_FRAMES // 2
    params["pos_embed"] = tn((1, num_tpatch * num_patches, EMBED_DIM))

    blocks, block_cfg = [], []
    dim, cur = EMBED_DIM, 0
    for i, (depth, nh, stride) in enumerate(zip(DEPTHS, NUM_HEADS, POOL_STRIDE)):
        dim_out = dim * 2 if i > 0 else dim
        for _ in range(depth):
            hidden = int(dim * MLP_RATIO)
            p = dict(
                n1g=jnp.ones((dim,), jnp.float32), n1b=jnp.zeros((dim,), jnp.float32),
                qkv_w=tn((dim, 3 * dim)), qkv_b=jnp.zeros((3 * dim,), jnp.float32),
                proj_w=tn((dim, dim)), proj_b=jnp.zeros((dim,), jnp.float32),
                n2g=jnp.ones((dim,), jnp.float32), n2b=jnp.zeros((dim,), jnp.float32),
                fc1_w=tn((dim, hidden)), fc1_b=jnp.zeros((hidden,), jnp.float32),
                fc2_w=tn((hidden, dim_out)), fc2_b=jnp.zeros((dim_out,), jnp.float32),
            )
            if dim != dim_out:
                p["pr_w"] = tn((dim, dim_out))
                p["pr_b"] = jnp.zeros((dim_out,), jnp.float32)
            blocks.append(p)
            block_cfg.append(dict(dim=dim, dim_out=dim_out, num_heads=nh,
                                  stride=stride if cur == 0 else (1, 1, 1)))
            dim = dim_out
            cur += 1
    params["blocks"] = blocks
    params["norm_g"] = jnp.ones((dim,), jnp.float32)
    params["norm_b"] = jnp.zeros((dim,), jnp.float32)
    params["head_w"] = tn((dim, NUM_CLASSES))
    params["head_b"] = jnp.zeros((NUM_CLASSES,), jnp.float32)
    return params, block_cfg


# -------------------------------- forward ------------------------------------
def enhanced_mvit_forward(params, x, block_cfg):
    tokens, thw = patch_embed(x, params["patch_w"], params["patch_b"],
                              params["pos_embed"], PATCH)   # bias + pos fused in kernel
    for p, cfg in zip(params["blocks"], block_cfg):
        tokens, thw = multiscale_block(tokens, thw, p, **cfg)
    return norm_mean_head(tokens, params["norm_g"], params["norm_b"],
                          params["head_w"], params["head_b"])


if __name__ == "__main__":
    key = jax.random.PRNGKey(0)
    pkey, xkey = jax.random.split(key)
    params, block_cfg = init_params(pkey)
    x = jax.random.normal(xkey, (BATCH, IN_CHANS, NUM_FRAMES, IMG, IMG), jnp.float32)

    fwd = jax.jit(functools.partial(enhanced_mvit_forward, block_cfg=block_cfg))
    out = fwd(params, x)
    out = jax.block_until_ready(out)
    assert out.shape == (BATCH, NUM_CLASSES), out.shape
    print("KERNEL_OK")
</pallas_src>

<mosaic_0001>
module attributes {stable_mosaic.version = 11 : i64} {
  func.func @_patch_embed_kernel(%arg0: i32, %arg1: memref<1x16x576xbf16, #tpu.memory_space<vmem>>, %arg2: memref<576x32xbf16, #tpu.memory_space<vmem>>, %arg3: memref<1x32xf32, #tpu.memory_space<vmem>>, %arg4: memref<16x32xf32, #tpu.memory_space<vmem>>, %arg5: memref<1x16x32xf32, #tpu.memory_space<vmem>>) attributes {dimension_semantics = [#tpu.dimension_semantics<parallel>], iteration_bounds = array<i64: 2>, scalar_prefetch = 0 : i64, scratch_operands = 0 : i64, tpu.core_type = #tpu.core_type<tc>, window_params = [{transform_indices = @transform_0, window_bounds = array<i64: 1, 16, 576>}, {pipeline_mode = #tpu.pipeline_mode<synchronous>, transform_indices = @transform_1, window_bounds = array<i64: 576, 32>}, {pipeline_mode = #tpu.pipeline_mode<synchronous>, transform_indices = @transform_2, window_bounds = array<i64: 1, 32>}, {pipeline_mode = #tpu.pipeline_mode<synchronous>, transform_indices = @transform_3, window_bounds = array<i64: 16, 32>}, {transform_indices = @transform_4, window_bounds = array<i64: 1, 16, 32>}]} {
    %c0 = arith.constant 0 : index
    %c0_0 = arith.constant 0 : index
    %c0_1 = arith.constant 0 : index
    %0 = vector.load %arg1[%c0, %c0_0, %c0_1] : memref<1x16x576xbf16, #tpu.memory_space<vmem>>, vector<1x16x576xbf16>
    %1 = vector.shape_cast %0 : vector<1x16x576xbf16> to vector<16x576xbf16>
    %c0_2 = arith.constant 0 : index
    %c0_3 = arith.constant 0 : index
    %2 = vector.load %arg2[%c0_2, %c0_3] : memref<576x32xbf16, #tpu.memory_space<vmem>>, vector<576x32xbf16>
    %cst = arith.constant dense<0.000000e+00> : vector<16x32xf32>
    %3 = tpu.matmul %1, %2, %cst {dimension_numbers = #tpu.dot_dimension_numbers<[1], [0], [0], [1], [0, 0, 1, 1], [], []>} : vector<16x576xbf16>, vector<576x32xbf16>, vector<16x32xf32> -> vector<16x32xf32>
    %c0_4 = arith.constant 0 : index
    %c0_5 = arith.constant 0 : index
    %4 = vector.load %arg3[%c0_4, %c0_5] : memref<1x32xf32, #tpu.memory_space<vmem>>, vector<1x32xf32>
    %5 = vector.broadcast %4 : vector<1x32xf32> to vector<16x32xf32>
    %6 = arith.addf %3, %5 : vector<16x32xf32>
    %c0_6 = arith.constant 0 : index
    %c0_7 = arith.constant 0 : index
    %7 = vector.load %arg4[%c0_6, %c0_7] : memref<16x32xf32, #tpu.memory_space<vmem>>, vector<16x32xf32>
    %8 = arith.addf %6, %7 : vector<16x32xf32>
    %c0_8 = arith.constant 0 : index
    %c0_9 = arith.constant 0 : index
    %c0_10 = arith.constant 0 : index
    %9 = vector.load %arg5[%c0_8, %c0_9, %c0_10] : memref<1x16x32xf32, #tpu.memory_space<vmem>>, vector<1x16x32xf32>
    %10 = vector.shape_cast %9 : vector<1x16x32xf32> to vector<16x32xf32>
    %11 = vector.shape_cast %8 : vector<16x32xf32> to vector<1x16x32xf32>
    tpu.vector_store %arg5[%c0_8, %c0_9, %c0_10], %11 {strides = array<i32>} : memref<1x16x32xf32, #tpu.memory_space<vmem>>, vector<1x16x32xf32>,
    return
  }
  func.func @transform_0(%arg0: i32) -> (i32, i32, i32) {
    %c0_i32 = arith.constant 0 : i32
    %c0_i32_0 = arith.constant 0 : i32
    %c0_i32_1 = arith.constant 0 : i32
    return %arg0, %c0_i32, %c0_i32_0 : i32, i32, i32
  }
  func.func @transform_1(%arg0: i32) -> (i32, i32) {
    %c0_i32 = arith.constant 0 : i32
    %c0_i32_0 = arith.constant 0 : i32
    %c0_i32_1 = arith.constant 0 : i32
    return %c0_i32, %c0_i32_0 : i32, i32
  }
  func.func @transform_2(%arg0: i32) -> (i32, i32) {
    %c0_i32 = arith.constant 0 : i32
    %c0_i32_0 = arith.constant 0 : i32
    %c0_i32_1 = arith.constant 0 : i32
    return %c0_i32, %c0_i32_0 : i32, i32
  }
  func.func @transform_3(%arg0: i32) -> (i32, i32) {
    %c0_i32 = arith.constant 0 : i32
    %c0_i32_0 = arith.constant 0 : i32
    %c0_i32_1 = arith.constant 0 : i32
    return %c0_i32, %c0_i32_0 : i32, i32
  }
  func.func @transform_4(%arg0: i32) -> (i32, i32, i32) {
    %c0_i32 = arith.constant 0 : i32
    %c0_i32_0 = arith.constant 0 : i32
    %c0_i32_1 = arith.constant 0 : i32
    return %arg0, %c0_i32, %c0_i32_0 : i32, i32, i32
  }
}

module attributes {stable_mosaic.version = 11 : i64} {
  func.func @_block_kernel(%arg0: i32, %arg1: memref<1x16x32xf32, #tpu.memory_space<vmem>>, %arg2: memref<4x16xf32, #tpu.memory_space<vmem>>, %arg3: memref<1x32xf32, #tpu.memory_space<vmem>>, %arg4: memref<1x32xf32, #tpu.memory_space<vmem>>, %arg5: memref<32x96xbf16, #tpu.memory_space<vmem>>, %arg6: memref<1x96xf32, #tpu.memory_space<vmem>>, %arg7: memref<32x32xbf16, #tpu.memory_space<vmem>>, %arg8: memref<1x32xf32, #tpu.memory_space<vmem>>, %arg9: memref<1x32xf32, #tpu.memory_space<vmem>>, %arg10: memref<1x32xf32, #tpu.memory_space<vmem>>, %arg11: memref<32x128xbf16, #tpu.memory_space<vmem>>, %arg12: memref<1x128xf32, #tpu.memory_space<vmem>>, %arg13: memref<128x32xbf16, #tpu.memory_space<vmem>>, %arg14: memref<1x32xf32, #tpu.memory_space<vmem>>, %arg15: memref<1x4x32xf32, #tpu.memory_space<vmem>>) attributes {dimension_semantics = [#tpu.dimension_semantics<parallel>], iteration_bounds = array<i64: 2>, scalar_prefetch = 0 : i64, scratch_operands = 0 : i64, tpu.core_type = #tpu.core_type<tc>, window_params = [{transform_indices = @transform_0, window_bounds = array<i64: 1, 16, 32>}, {pipeline_mode = #tpu.pipeline_mode<synchronous>, transform_indices = @transform_1, window_bounds = array<i64: 4, 16>}, {pipeline_mode = #tpu.pipeline_mode<synchronous>, transform_indices = @transform_2, window_bounds = array<i64: 1, 32>}, {pipeline_mode = #tpu.pipeline_mode<synchronous>, transform_indices = @transform_3, window_bounds = array<i64: 1, 32>}, {pipeline_mode = #tpu.pipeline_mode<synchronous>, transform_indices = @transform_4, window_bounds = array<i64: 32, 96>}, {pipeline_mode = #tpu.pipeline_mode<synchronous>, transform_indices = @transform_5, window_bounds = array<i64: 1, 96>}, {pipeline_mode = #tpu.pipeline_mode<synchronous>, transform_indices = @transform_6, window_bounds = array<i64: 32, 32>}, {pipeline_mode = #tpu.pipeline_mode<synchronous>, transform_indices = @transform_7, window_bounds = array<i64: 1, 32>}, {pipeline_mode = #tpu.pipeline_mode<synchronous>, transform_indices = @transform_8, window_bounds = array<i64: 1, 32>}, {pipeline_mode = #tpu.pipeline_mode<synchronous>, transform_indices = @transform_9, window_bounds = array<i64: 1, 32>}, {pipeline_mode = #tpu.pipeline_mode<synchronous>, transform_indices = @transform_10, window_bounds = array<i64: 32, 128>}, {pipeline_mode = #tpu.pipeline_mode<synchronous>, transform_indices = @transform_11, window_bounds = array<i64: 1, 128>}, {pipeline_mode = #tpu.pipeline_mode<synchronous>, transform_indices = @transform_12, window_bounds = array<i64: 128, 32>}, {pipeline_mode = #tpu.pipeline_mode<synchronous>, transform_indices = @transform_13, window_bounds = array<i64: 1, 32>}, {transform_indices = @transform_14, window_bounds = array<i64: 1, 4, 32>}]} {
    %c0 = arith.constant 0 : index
    %c0_0 = arith.constant 0 : index
    %c0_1 = arith.constant 0 : index
    %0 = vector.load %arg1[%c0, %c0_0, %c0_1] : memref<1x16x32xf32, #tpu.memory_space<vmem>>, vector<1x16x32xf32>
    %1 = vector.shape_cast %0 : vector<1x16x32xf32> to vector<16x32xf32>
    %c0_2 = arith.constant 0 : index
    %c0_3 = arith.constant 0 : index
    %2 = vector.load %arg3[%c0_2, %c0_3] : memref<1x32xf32, #tpu.memory_space<vmem>>, vector<1x32xf32>
    %c0_4 = arith.constant 0 : index
    %c0_5 = arith.constant 0 : index
    %3 = vector.load %arg4[%c0_4, %c0_5] : memref<1x32xf32, #tpu.memory_space<vmem>>, vector<1x32xf32>
    %cst = arith.constant dense<0.000000e+00> : vector<16xf32>
    %4 = vector.multi_reduction <add>, %1, %cst [1] : vector<16x32xf32> to vector<16xf32>
    %5 = vector.shape_cast %4 : vector<16xf32> to vector<16x1xf32>
    %cst_6 = arith.constant 3.200000e+01 : f32
    %6 = vector.broadcast %cst_6 : f32 to vector<16x1xf32>
    %7 = arith.divf %5, %6 : vector<16x1xf32>
    %8 = vector.broadcast %7 : vector<16x1xf32> to vector<16x32xf32>
    %9 = arith.subf %1, %8 : vector<16x32xf32>
    %10 = arith.mulf %9, %9 : vector<16x32xf32>
    %cst_7 = arith.constant dense<0.000000e+00> : vector<16xf32>
    %11 = vector.multi_reduction <add>, %10, %cst_7 [1] : vector<16x32xf32> to vector<16xf32>
    %12 = vector.shape_cast %11 : vector<16xf32> to vector<16x1xf32>
    %cst_8 = arith.constant 3.200000e+01 : f32
    %13 = vector.broadcast %cst_8 : f32 to vector<16x1xf32>
    %14 = arith.divf %12, %13 : vector<16x1xf32>
    %15 = vector.broadcast %7 : vector<16x1xf32> to vector<16x32xf32>
    %16 = arith.subf %1, %15 : vector<16x32xf32>
    %cst_9 = arith.constant 9.99999974E-6 : f32
    %17 = vector.broadcast %cst_9 : f32 to vector<16x1xf32>
    %18 = arith.addf %14, %17 : vector<16x1xf32>
    %19 = math.rsqrt %18 : vector<16x1xf32>
    %20 = vector.broadcast %19 : vector<16x1xf32> to vector<16x32xf32>
    %21 = arith.mulf %16, %20 : vector<16x32xf32>
    %22 = vector.broadcast %2 : vector<1x32xf32> to vector<16x32xf32>
    %23 = arith.mulf %21, %22 : vector<16x32xf32>
    %24 = vector.broadcast %3 : vector<1x32xf32> to vector<16x32xf32>
    %25 = arith.addf %23, %24 : vector<16x32xf32>
    %26 = arith.truncf %25 : vector<16x32xf32> to vector<16x32xbf16>
    %c0_10 = arith.constant 0 : index
    %c0_11 = arith.constant 0 : index
    %27 = vector.load %arg5[%c0_10, %c0_11] : memref<32x96xbf16, #tpu.memory_space<vmem>>, vector<32x96xbf16>
    %cst_12 = arith.constant dense<0.000000e+00> : vector<16x96xf32>
    %28 = tpu.matmul %26, %27, %cst_12 {dimension_numbers = #tpu.dot_dimension_numbers<[1], [0], [0], [1], [0, 0, 1, 1], [], []>} : vector<16x32xbf16>, vector<32x96xbf16>, vector<16x96xf32> -> vector<16x96xf32>
    %c0_13 = arith.constant 0 : index
    %c0_14 = arith.constant 0 : index
    %29 = vector.load %arg6[%c0_13, %c0_14] : memref<1x96xf32, #tpu.memory_space<vmem>>, vector<1x96xf32>
    %30 = vector.broadcast %29 : vector<1x96xf32> to vector<16x96xf32>
    %31 = arith.addf %28, %30 : vector<16x96xf32>
    %32 = vector.extract_strided_slice %31 {offsets = [0, 0], sizes = [16, 32], strides = [1, 1]} : vector<16x96xf32> to vector<16x32xf32>
    %33 = vector.extract_strided_slice %31 {offsets = [0, 32], sizes = [16, 32], strides = [1, 1]} : vector<16x96xf32> to vector<16x32xf32>
    %34 = vector.extract_strided_slice %31 {offsets = [0, 64], sizes = [16, 32], strides = [1, 1]} : vector<16x96xf32> to vector<16x32xf32>
    %c0_15 = arith.constant 0 : index
    %c0_16 = arith.constant 0 : index
    %35 = vector.load %arg2[%c0_15, %c0_16] : memref<4x16xf32, #tpu.memory_space<vmem>>, vector<4x16xf32>
    %cst_17 = arith.constant dense<0.000000e+00> : vector<4x32xf32>
    %36 = tpu.matmul %35, %32, %cst_17 {dimension_numbers = #tpu.dot_dimension_numbers<[1], [0], [0], [1], [0, 0, 1, 1], [], []>} : vector<4x16xf32>, vector<16x32xf32>, vector<4x32xf32> -> vector<4x32xf32>
    %cst_18 = arith.constant dense<0.000000e+00> : vector<4x32xf32>
    %37 = tpu.matmul %35, %1, %cst_18 {dimension_numbers = #tpu.dot_dimension_numbers<[1], [0], [0], [1], [0, 0, 1, 1], [], []>} : vector<4x16xf32>, vector<16x32xf32>, vector<4x32xf32> -> vector<4x32xf32>
    %38 = arith.truncf %36 : vector<4x32xf32> to vector<4x32xbf16>
    %39 = arith.truncf %33 : vector<16x32xf32> to vector<16x32xbf16>
    %40 = arith.truncf %34 : vector<16x32xf32> to vector<16x32xbf16>
    %cst_19 = arith.constant dense<0.000000e+00> : vector<4x16xf32>
    %41 = tpu.matmul %38, %39, %cst_19 {dimension_numbers = #tpu.dot_dimension_numbers<[1], [1], [0], [0], [0, 0, 1, 0], [], []>} : vector<4x32xbf16>, vector<16x32xbf16>, vector<4x16xf32> -> vector<4x16xf32>
    %cst_20 = arith.constant 0.176776692 : f32
    %42 = vector.broadcast %cst_20 : f32 to vector<4x16xf32>
    %43 = arith.mulf %41, %42 : vector<4x16xf32>
    %cst_21 = arith.constant dense<0xFF800000> : vector<4xf32>
    %44 = vector.multi_reduction <maximumf>, %43, %cst_21 [1] : vector<4x16xf32> to vector<4xf32>
    %45 = vector.shape_cast %44 : vector<4xf32> to vector<4x1xf32>
    %46 = vector.broadcast %45 : vector<4x1xf32> to vector<4x16xf32>
    %47 = arith.subf %43, %46 : vector<4x16xf32>
    %48 = math.exp %47 : vector<4x16xf32>
    %cst_22 = arith.constant dense<0.000000e+00> : vector<4xf32>
    %49 = vector.multi_reduction <add>, %48, %cst_22 [1] : vector<4x16xf32> to vector<4xf32>
    %50 = vector.shape_cast %49 : vector<4xf32> to vector<4x1xf32>
    %51 = tpu.reciprocal %50 {approx = true} : vector<4x1xf32> -> vector<4x1xf32>
    %52 = vector.broadcast %51 : vector<4x1xf32> to vector<4x16xf32>
    %53 = arith.mulf %48, %52 : vector<4x16xf32>
    %54 = arith.truncf %53 : vector<4x16xf32> to vector<4x16xbf16>
    %cst_23 = arith.constant dense<0.000000e+00> : vector<4x32xf32>
    %55 = tpu.matmul %54, %40, %cst_23 {dimension_numbers = #tpu.dot_dimension_numbers<[1], [0], [0], [1], [0, 0, 1, 1], [], []>} : vector<4x16xbf16>, vector<16x32xbf16>, vector<4x32xf32> -> vector<4x32xf32>
    %56 = arith.truncf %55 : vector<4x32xf32> to vector<4x32xbf16>
    %c0_24 = arith.constant 0 : index
    %c0_25 = arith.constant 0 : index
    %57 = vector.load %arg7[%c0_24, %c0_25] : memref<32x32xbf16, #tpu.memory_space<vmem>>, vector<32x32xbf16>
    %cst_26 = arith.constant dense<0.000000e+00> : vector<4x32xf32>
    %58 = tpu.matmul %56, %57, %cst_26 {dimension_numbers = #tpu.dot_dimension_numbers<[1], [0], [0], [1], [0, 0, 1, 1], [], []>} : vector<4x32xbf16>, vector<32x32xbf16>, vector<4x32xf32> -> vector<4x32xf32>
    %c0_27 = arith.constant 0 : index
    %c0_28 = arith.constant 0 : index
    %59 = vector.load %arg8[%c0_27, %c0_28] : memref<1x32xf32, #tpu.memory_space<vmem>>, vector<1x32xf32>
    %60 = vector.broadcast %59 : vector<1x32xf32> to vector<4x32xf32>
    %61 = arith.addf %58, %60 : vector<4x32xf32>
    %62 = arith.addf %37, %61 : vector<4x32xf32>
    %c0_29 = arith.constant 0 : index
    %c0_30 = arith.constant 0 : index
    %63 = vector.load %arg9[%c0_29, %c0_30] : memref<1x32xf32, #tpu.memory_space<vmem>>, vector<1x32xf32>
    %c0_31 = arith.constant 0 : index
    %c0_32 = arith.constant 0 : index
    %64 = vector.load %arg10[%c0_31, %c0_32] : memref<1x32xf32, #tpu.memory_space<vmem>>, vector<1x32xf32>
    %cst_33 = arith.constant dense<0.000000e+00> : vector<4xf32>
    %65 = vector.multi_reduction <add>, %62, %cst_33 [1] : vector<4x32xf32> to vector<4xf32>
    %66 = vector.shape_cast %65 : vector<4xf32> to vector<4x1xf32>
    %cst_34 = arith.constant 3.200000e+01 : f32
    %67 = vector.broadcast %cst_34 : f32 to vector<4x1xf32>
    %68 = arith.divf %66, %67 : vector<4x1xf32>
    %69 = vector.broadcast %68 : vector<4x1xf32> to vector<4x32xf32>
    %70 = arith.subf %62, %69 : vector<4x32xf32>
    %71 = arith.mulf %70, %70 : vector<4x32xf32>
    %cst_35 = arith.constant dense<0.000000e+00> : vector<4xf32>
    %72 = vector.multi_reduction <add>, %71, %cst_35 [1] : vector<4x32xf32> to vector<4xf32>
    %73 = vector.shape_cast %72 : vector<4xf32> to vector<4x1xf32>
    %cst_36 = arith.constant 3.200000e+01 : f32
    %74 = vector.broadcast %cst_36 : f32 to vector<4x1xf32>
    %75 = arith.divf %73, %74 : vector<4x1xf32>
    %76 = vector.broadcast %68 : vector<4x1xf32> to vector<4x32xf32>
    %77 = arith.subf %62, %76 : vector<4x32xf32>
    %cst_37 = arith.constant 9.99999974E-6 : f32
    %78 = vector.broadcast %cst_37 : f32 to vector<4x1xf32>
    %79 = arith.addf %75, %78 : vector<4x1xf32>
    %80 = math.rsqrt %79 : vector<4x1xf32>
    %81 = vector.broadcast %80 : vector<4x1xf32> to vector<4x32xf32>
    %82 = arith.mulf %77, %81 : vector<4x32xf32>
    %83 = vector.broadcast %63 : vector<1x32xf32> to vector<4x32xf32>
    %84 = arith.mulf %82, %83 : vector<4x32xf32>
    %85 = vector.broadcast %64 : vector<1x32xf32> to vector<4x32xf32>
    %86 = arith.addf %84, %85 : vector<4x32xf32>
    %87 = arith.truncf %86 : vector<4x32xf32> to vector<4x32xbf16>
    %c0_38 = arith.constant 0 : index
    %c0_39 = arith.constant 0 : index
    %88 = vector.load %arg11[%c0_38, %c0_39] : memref<32x128xbf16, #tpu.memory_space<vmem>>, vector<32x128xbf16>
    %cst_40 = arith.constant dense<0.000000e+00> : vector<4x128xf32>
    %89 = tpu.matmul %87, %88, %cst_40 {dimension_numbers = #tpu.dot_dimension_numbers<[1], [0], [0], [1], [0, 0, 1, 1], [], []>} : vector<4x32xbf16>, vector<32x128xbf16>, vector<4x128xf32> -> vector<4x128xf32>
    %c0_41 = arith.constant 0 : index
    %c0_42 = arith.constant 0 : index
    %90 = vector.load %arg12[%c0_41, %c0_42] : memref<1x128xf32, #tpu.memory_space<vmem>>, vector<1x128xf32>
    %91 = vector.broadcast %90 : vector<1x128xf32> to vector<4x128xf32>
    %92 = arith.addf %89, %91 : vector<4x128xf32>
    %93 = arith.mulf %92, %92 : vector<4x128xf32>
    %94 = arith.mulf %92, %93 : vector<4x128xf32>
    %cst_43 = arith.constant 4.471500e-02 : f32
    %95 = vector.broadcast %cst_43 : f32 to vector<4x128xf32>
    %96 = arith.mulf %95, %94 : vector<4x128xf32>
    %97 = arith.addf %92, %96 : vector<4x128xf32>
    %cst_44 = arith.constant 0.797884583 : f32
    %98 = vector.broadcast %cst_44 : f32 to vector<4x128xf32>
    %99 = arith.mulf %98, %97 : vector<4x128xf32>
    %100 = math.tanh %99 : vector<4x128xf32>
    %cst_45 = arith.constant 1.000000e+00 : f32
    %101 = vector.broadcast %cst_45 : f32 to vector<4x128xf32>
    %102 = arith.addf %101, %100 : vector<4x128xf32>
    %cst_46 = arith.constant 5.000000e-01 : f32
    %103 = vector.broadcast %cst_46 : f32 to vector<4x128xf32>
    %104 = arith.mulf %103, %102 : vector<4x128xf32>
    %105 = arith.mulf %92, %104 : vector<4x128xf32>
    %106 = arith.truncf %105 : vector<4x128xf32> to vector<4x128xbf16>
    %c0_47 = arith.constant 0 : index
    %c0_48 = arith.constant 0 : index
    %107 = vector.load %arg13[%c0_47, %c0_48] : memref<128x32xbf16, #tpu.memory_space<vmem>>, vector<128x32xbf16>
    %cst_49 = arith.constant dense<0.000000e+00> : vector<4x32xf32>
    %108 = tpu.matmul %106, %107, %cst_49 {dimension_numbers = #tpu.dot_dimension_numbers<[1], [0], [0], [1], [0, 0, 1, 1], [], []>} : vector<4x128xbf16>, vector<128x32xbf16>, vector<4x32xf32> -> vector<4x32xf32>
    %c0_50 = arith.constant 0 : index
    %c0_51 = arith.constant 0 : index
    %109 = vector.load %arg14[%c0_50, %c0_51] : memref<1x32xf32, #tpu.memory_space<vmem>>, vector<1x32xf32>
    %110 = vector.broadcast %109 : vector<1x32xf32> to vector<4x32xf32>
    %111 = arith.addf %108, %110 : vector<4x32xf32>
    %112 = arith.addf %62, %111 : vector<4x32xf32>
    %c0_52 = arith.constant 0 : index
    %c0_53 = arith.constant 0 : index
    %c0_54 = arith.constant 0 : index
    %113 = vector.load %arg15[%c0_52, %c0_53, %c0_54] : memref<1x4x32xf32, #tpu.memory_space<vmem>>, vector<1x4x32xf32>
    %114 = vector.shape_cast %113 : vector<1x4x32xf32> to vector<4x32xf32>
    %115 = vector.shape_cast %112 : vector<4x32xf32> to vector<1x4x32xf32>
    tpu.vector_store %arg15[%c0_52, %c0_53, %c0_54], %115 {strides = array<i32>} : memref<1x4x32xf32, #tpu.memory_space<vmem>>, vector<1x4x32xf32>,
    return
  }
  func.func @transform_0(%arg0: i32) -> (i32, i32, i32) {
    %c0_i32 = arith.constant 0 : i32
    %c0_i32_0 = arith.constant 0 : i32
    %c0_i32_1 = arith.constant 0 : i32
    return %arg0, %c0_i32, %c0_i32_0 : i32, i32, i32
  }
  func.func @transform_1(%arg0: i32) -> (i32, i32) {
    %c0_i32 = arith.constant 0 : i32
    %c0_i32_0 = arith.constant 0 : i32
    %c0_i32_1 = arith.constant 0 : i32
    return %c0_i32, %c0_i32_0 : i32, i32
  }
  func.func @transform_2(%arg0: i32) -> (i32, i32) {
    %c0_i32 = arith.constant 0 : i32
    %c0_i32_0 = arith.constant 0 : i32
    %c0_i32_1 = arith.constant 0 : i32
    return %c0_i32, %c0_i32_0 : i32, i32
  }
  func.func @transform_3(%arg0: i32) -> (i32, i32) {
    %c0_i32 = arith.constant 0 : i32
    %c0_i32_0 = arith.constant 0 : i32
    %c0_i32_1 = arith.constant 0 : i32
    return %c0_i32, %c0_i32_0 : i32, i32
  }
  func.func @transform_4(%arg0: i32) -> (i32, i32) {
    %c0_i32 = arith.constant 0 : i32
    %c0_i32_0 = arith.constant 0 : i32
    %c0_i32_1 = arith.constant 0 : i32
    return %c0_i32, %c0_i32_0 : i32, i32
  }
  func.func @transform_5(%arg0: i32) -> (i32, i32) {
    %c0_i32 = arith.constant 0 : i32
    %c0_i32_0 = arith.constant 0 : i32
    %c0_i32_1 = arith.constant 0 : i32
    return %c0_i32, %c0_i32_0 : i32, i32
  }
  func.func @transform_6(%arg0: i32) -> (i32, i32) {
    %c0_i32 = arith.constant 0 : i32
    %c0_i32_0 = arith.constant 0 : i32
    %c0_i32_1 = arith.constant 0 : i32
    return %c0_i32, %c0_i32_0 : i32, i32
  }
  func.func @transform_7(%arg0: i32) -> (i32, i32) {
    %c0_i32 = arith.constant 0 : i32
    %c0_i32_0 = arith.constant 0 : i32
    %c0_i32_1 = arith.constant 0 : i32
    return %c0_i32, %c0_i32_0 : i32, i32
  }
  func.func @transform_8(%arg0: i32) -> (i32, i32) {
    %c0_i32 = arith.constant 0 : i32
    %c0_i32_0 = arith.constant 0 : i32
    %c0_i32_1 = arith.constant 0 : i32
    return %c0_i32, %c0_i32_0 : i32, i32
  }
  func.func @transform_9(%arg0: i32) -> (i32, i32) {
    %c0_i32 = arith.constant 0 : i32
    %c0_i32_0 = arith.constant 0 : i32
    %c0_i32_1 = arith.constant 0 : i32
    return %c0_i32, %c0_i32_0 : i32, i32
  }
  func.func @transform_10(%arg0: i32) -> (i32, i32) {
    %c0_i32 = arith.constant 0 : i32
    %c0_i32_0 = arith.constant 0 : i32
    %c0_i32_1 = arith.constant 0 : i32
    return %c0_i32, %c0_i32_0 : i32, i32
  }
  func.func @transform_11(%arg0: i32) -> (i32, i32) {
    %c0_i32 = arith.constant 0 : i32
    %c0_i32_0 = arith.constant 0 : i32
    %c0_i32_1 = arith.constant 0 : i32
    return %c0_i32, %c0_i32_0 : i32, i32
  }
  func.func @transform_12(%arg0: i32) -> (i32, i32) {
    %c0_i32 = arith.constant 0 : i32
    %c0_i32_0 = arith.constant 0 : i32
    %c0_i32_1 = arith.constant 0 : i32
    return %c0_i32, %c0_i32_0 : i32, i32
  }
  func.func @transform_13(%arg0: i32) -> (i32, i32) {
    %c0_i32 = arith.constant 0 : i32
    %c0_i32_0 = arith.constant 0 : i32
    %c0_i32_1 = arith.constant 0 : i32
    return %c0_i32, %c0_i32_0 : i32, i32
  }
  func.func @transform_14(%arg0: i32) -> (i32, i32, i32) {
    %c0_i32 = arith.constant 0 : i32
    %c0_i32_0 = arith.constant 0 : i32
    %c0_i32_1 = arith.constant 0 : i32
    return %arg0, %c0_i32, %c0_i32_0 : i32, i32, i32
  }
}

module attributes {stable_mosaic.version = 11 : i64} {
  func.func @_block_kernel(%arg0: i32, %arg1: memref<1x4x32xf32, #tpu.memory_space<vmem>>, %arg2: memref<1x32xf32, #tpu.memory_space<vmem>>, %arg3: memref<1x32xf32, #tpu.memory_space<vmem>>, %arg4: memref<32x96xbf16, #tpu.memory_space<vmem>>, %arg5: memref<1x96xf32, #tpu.memory_space<vmem>>, %arg6: memref<32x32xbf16, #tpu.memory_space<vmem>>, %arg7: memref<1x32xf32, #tpu.memory_space<vmem>>, %arg8: memref<1x32xf32, #tpu.memory_space<vmem>>, %arg9: memref<1x32xf32, #tpu.memory_space<vmem>>, %arg10: memref<32x128xbf16, #tpu.memory_space<vmem>>, %arg11: memref<1x128xf32, #tpu.memory_space<vmem>>, %arg12: memref<128x64xbf16, #tpu.memory_space<vmem>>, %arg13: memref<1x64xf32, #tpu.memory_space<vmem>>, %arg14: memref<32x64xbf16, #tpu.memory_space<vmem>>, %arg15: memref<1x64xf32, #tpu.memory_space<vmem>>, %arg16: memref<1x4x64xf32, #tpu.memory_space<vmem>>) attributes {dimension_semantics = [#tpu.dimension_semantics<parallel>], iteration_bounds = array<i64: 2>, scalar_prefetch = 0 : i64, scratch_operands = 0 : i64, tpu.core_type = #tpu.core_type<tc>, window_params = [{transform_indices = @transform_0, window_bounds = array<i64: 1, 4, 32>}, {pipeline_mode = #tpu.pipeline_mode<synchronous>, transform_indices = @transform_1, window_bounds = array<i64: 1, 32>}, {pipeline_mode = #tpu.pipeline_mode<synchronous>, transform_indices = @transform_2, window_bounds = array<i64: 1, 32>}, {pipeline_mode = #tpu.pipeline_mode<synchronous>, transform_indices = @transform_3, window_bounds = array<i64: 32, 96>}, {pipeline_mode = #tpu.pipeline_mode<synchronous>, transform_indices = @transform_4, window_bounds = array<i64: 1, 96>}, {pipeline_mode = #tpu.pipeline_mode<synchronous>, transform_indices = @transform_5, window_bounds = array<i64: 32, 32>}, {pipeline_mode = #tpu.pipeline_mode<synchronous>, transform_indices = @transform_6, window_bounds = array<i64: 1, 32>}, {pipeline_mode = #tpu.pipeline_mode<synchronous>, transform_indices = @transform_7, window_bounds = array<i64: 1, 32>}, {pipeline_mode = #tpu.pipeline_mode<synchronous>, transform_indices = @transform_8, window_bounds = array<i64: 1, 32>}, {pipeline_mode = #tpu.pipeline_mode<synchronous>, transform_indices = @transform_9, window_bounds = array<i64: 32, 128>}, {pipeline_mode = #tpu.pipeline_mode<synchronous>, transform_indices = @transform_10, window_bounds = array<i64: 1, 128>}, {pipeline_mode = #tpu.pipeline_mode<synchronous>, transform_indices = @transform_11, window_bounds = array<i64: 128, 64>}, {pipeline_mode = #tpu.pipeline_mode<synchronous>, transform_indices = @transform_12, window_bounds = array<i64: 1, 64>}, {pipeline_mode = #tpu.pipeline_mode<synchronous>, transform_indices = @transform_13, window_bounds = array<i64: 32, 64>}, {pipeline_mode = #tpu.pipeline_mode<synchronous>, transform_indices = @transform_14, window_bounds = array<i64: 1, 64>}, {transform_indices = @transform_15, window_bounds = array<i64: 1, 4, 64>}]} {
    %c0 = arith.constant 0 : index
    %c0_0 = arith.constant 0 : index
    %c0_1 = arith.constant 0 : index
    %0 = vector.load %arg1[%c0, %c0_0, %c0_1] : memref<1x4x32xf32, #tpu.memory_space<vmem>>, vector<1x4x32xf32>
    %1 = vector.shape_cast %0 : vector<1x4x32xf32> to vector<4x32xf32>
    %c0_2 = arith.constant 0 : index
    %c0_3 = arith.constant 0 : index
    %2 = vector.load %arg2[%c0_2, %c0_3] : memref<1x32xf32, #tpu.memory_space<vmem>>, vector<1x32xf32>
    %c0_4 = arith.constant 0 : index
    %c0_5 = arith.constant 0 : index
    %3 = vector.load %arg3[%c0_4, %c0_5] : memref<1x32xf32, #tpu.memory_space<vmem>>, vector<1x32xf32>
    %cst = arith.constant dense<0.000000e+00> : vector<4xf32>
    %4 = vector.multi_reduction <add>, %1, %cst [1] : vector<4x32xf32> to vector<4xf32>
    %5 = vector.shape_cast %4 : vector<4xf32> to vector<4x1xf32>
    %cst_6 = arith.constant 3.200000e+01 : f32
    %6 = vector.broadcast %cst_6 : f32 to vector<4x1xf32>
    %7 = arith.divf %5, %6 : vector<4x1xf32>
    %8 = vector.broadcast %7 : vector<4x1xf32> to vector<4x32xf32>
    %9 = arith.subf %1, %8 : vector<4x32xf32>
    %10 = arith.mulf %9, %9 : vector<4x32xf32>
    %cst_7 = arith.constant dense<0.000000e+00> : vector<4xf32>
    %11 = vector.multi_reduction <add>, %10, %cst_7 [1] : vector<4x32xf32> to vector<4xf32>
    %12 = vector.shape_cast %11 : vector<4xf32> to vector<4x1xf32>
    %cst_8 = arith.constant 3.200000e+01 : f32
    %13 = vector.broadcast %cst_8 : f32 to vector<4x1xf32>
    %14 = arith.divf %12, %13 : vector<4x1xf32>
    %15 = vector.broadcast %7 : vector<4x1xf32> to vector<4x32xf32>
    %16 = arith.subf %1, %15 : vector<4x32xf32>
    %cst_9 = arith.constant 9.99999974E-6 : f32
    %17 = vector.broadcast %cst_9 : f32 to vector<4x1xf32>
    %18 = arith.addf %14, %17 : vector<4x1xf32>
    %19 = math.rsqrt %18 : vector<4x1xf32>
    %20 = vector.broadcast %19 : vector<4x1xf32> to vector<4x32xf32>
    %21 = arith.mulf %16, %20 : vector<4x32xf32>
    %22 = vector.broadcast %2 : vector<1x32xf32> to vector<4x32xf32>
    %23 = arith.mulf %21, %22 : vector<4x32xf32>
    %24 = vector.broadcast %3 : vector<1x32xf32> to vector<4x32xf32>
    %25 = arith.addf %23, %24 : vector<4x32xf32>
    %26 = arith.truncf %25 : vector<4x32xf32> to vector<4x32xbf16>
    %c0_10 = arith.constant 0 : index
    %c0_11 = arith.constant 0 : index
    %27 = vector.load %arg4[%c0_10, %c0_11] : memref<32x96xbf16, #tpu.memory_space<vmem>>, vector<32x96xbf16>
    %cst_12 = arith.constant dense<0.000000e+00> : vector<4x96xf32>
    %28 = tpu.matmul %26, %27, %cst_12 {dimension_numbers = #tpu.dot_dimension_numbers<[1], [0], [0], [1], [0, 0, 1, 1], [], []>} : vector<4x32xbf16>, vector<32x96xbf16>, vector<4x96xf32> -> vector<4x96xf32>
    %c0_13 = arith.constant 0 : index
    %c0_14 = arith.constant 0 : index
    %29 = vector.load %arg5[%c0_13, %c0_14] : memref<1x96xf32, #tpu.memory_space<vmem>>, vector<1x96xf32>
    %30 = vector.broadcast %29 : vector<1x96xf32> to vector<4x96xf32>
    %31 = arith.addf %28, %30 : vector<4x96xf32>
    %32 = vector.extract_strided_slice %31 {offsets = [0, 0], sizes = [4, 32], strides = [1, 1]} : vector<4x96xf32> to vector<4x32xf32>
    %33 = vector.extract_strided_slice %31 {offsets = [0, 32], sizes = [4, 32], strides = [1, 1]} : vector<4x96xf32> to vector<4x32xf32>
    %34 = vector.extract_strided_slice %31 {offsets = [0, 64], sizes = [4, 32], strides = [1, 1]} : vector<4x96xf32> to vector<4x32xf32>
    %35 = vector.extract_strided_slice %32 {offsets = [0, 0], sizes = [4, 16], strides = [1, 1]} : vector<4x32xf32> to vector<4x16xf32>
    %36 = arith.truncf %35 : vector<4x16xf32> to vector<4x16xbf16>
    %37 = vector.extract_strided_slice %33 {offsets = [0, 0], sizes = [4, 16], strides = [1, 1]} : vector<4x32xf32> to vector<4x16xf32>
    %38 = arith.truncf %37 : vector<4x16xf32> to vector<4x16xbf16>
    %39 = vector.extract_strided_slice %34 {offsets = [0, 0], sizes = [4, 16], strides = [1, 1]} : vector<4x32xf32> to vector<4x16xf32>
    %40 = arith.truncf %39 : vector<4x16xf32> to vector<4x16xbf16>
    %cst_15 = arith.constant dense<0.000000e+00> : vector<4x4xf32>
    %41 = tpu.matmul %36, %38, %cst_15 {dimension_numbers = #tpu.dot_dimension_numbers<[1], [1], [0], [0], [0, 0, 1, 0], [], []>} : vector<4x16xbf16>, vector<4x16xbf16>, vector<4x4xf32> -> vector<4x4xf32>
    %cst_16 = arith.constant 2.500000e-01 : f32
    %42 = vector.broadcast %cst_16 : f32 to vector<4x4xf32>
    %43 = arith.mulf %41, %42 : vector<4x4xf32>
    %cst_17 = arith.constant dense<0xFF800000> : vector<4xf32>
    %44 = vector.multi_reduction <maximumf>, %43, %cst_17 [1] : vector<4x4xf32> to vector<4xf32>
    %45 = vector.shape_cast %44 : vector<4xf32> to vector<4x1xf32>
    %46 = vector.broadcast %45 : vector<4x1xf32> to vector<4x4xf32>
    %47 = arith.subf %43, %46 : vector<4x4xf32>
    %48 = math.exp %47 : vector<4x4xf32>
    %cst_18 = arith.constant dense<0.000000e+00> : vector<4xf32>
    %49 = vector.multi_reduction <add>, %48, %cst_18 [1] : vector<4x4xf32> to vector<4xf32>
    %50 = vector.shape_cast %49 : vector<4xf32> to vector<4x1xf32>
    %51 = tpu.reciprocal %50 {approx = true} : vector<4x1xf32> -> vector<4x1xf32>
    %52 = vector.broadcast %51 : vector<4x1xf32> to vector<4x4xf32>
    %53 = arith.mulf %48, %52 : vector<4x4xf32>
    %54 = arith.truncf %53 : vector<4x4xf32> to vector<4x4xbf16>
    %cst_19 = arith.constant dense<0.000000e+00> : vector<4x16xf32>
    %55 = tpu.matmul %54, %40, %cst_19 {dimension_numbers = #tpu.dot_dimension_numbers<[1], [0], [0], [1], [0, 0, 1, 1], [], []>} : vector<4x4xbf16>, vector<4x16xbf16>, vector<4x16xf32> -> vector<4x16xf32>
    %56 = vector.extract_strided_slice %32 {offsets = [0, 16], sizes = [4, 16], strides = [1, 1]} : vector<4x32xf32> to vector<4x16xf32>
    %57 = arith.truncf %56 : vector<4x16xf32> to vector<4x16xbf16>
    %58 = vector.extract_strided_slice %33 {offsets = [0, 16], sizes = [4, 16], strides = [1, 1]} : vector<4x32xf32> to vector<4x16xf32>
    %59 = arith.truncf %58 : vector<4x16xf32> to vector<4x16xbf16>
    %60 = vector.extract_strided_slice %34 {offsets = [0, 16], sizes = [4, 16], strides = [1, 1]} : vector<4x32xf32> to vector<4x16xf32>
    %61 = arith.truncf %60 : vector<4x16xf32> to vector<4x16xbf16>
    %cst_20 = arith.constant dense<0.000000e+00> : vector<4x4xf32>
    %62 = tpu.matmul %57, %59, %cst_20 {dimension_numbers = #tpu.dot_dimension_numbers<[1], [1], [0], [0], [0, 0, 1, 0], [], []>} : vector<4x16xbf16>, vector<4x16xbf16>, vector<4x4xf32> -> vector<4x4xf32>
    %cst_21 = arith.constant 2.500000e-01 : f32
    %63 = vector.broadcast %cst_21 : f32 to vector<4x4xf32>
    %64 = arith.mulf %62, %63 : vector<4x4xf32>
    %cst_22 = arith.constant dense<0xFF800000> : vector<4xf32>
    %65 = vector.multi_reduction <maximumf>, %64, %cst_22 [1] : vector<4x4xf32> to vector<4xf32>
    %66 = vector.shape_cast %65 : vector<4xf32> to vector<4x1xf32>
    %67 = vector.broadcast %66 : vector<4x1xf32> to vector<4x4xf32>
    %68 = arith.subf %64, %67 : vector<4x4xf32>
    %69 = math.exp %68 : vector<4x4xf32>
    %cst_23 = arith.constant dense<0.000000e+00> : vector<4xf32>
    %70 = vector.multi_reduction <add>, %69, %cst_23 [1] : vector<4x4xf32> to vector<4xf32>
    %71 = vector.shape_cast %70 : vector<4xf32> to vector<4x1xf32>
    %72 = tpu.reciprocal %71 {approx = true} : vector<4x1xf32> -> vector<4x1xf32>
    %73 = vector.broadcast %72 : vector<4x1xf32> to vector<4x4xf32>
    %74 = arith.mulf %69, %73 : vector<4x4xf32>
    %75 = arith.truncf %74 : vector<4x4xf32> to vector<4x4xbf16>
    %cst_24 = arith.constant dense<0.000000e+00> : vector<4x16xf32>
    %76 = tpu.matmul %75, %61, %cst_24 {dimension_numbers = #tpu.dot_dimension_numbers<[1], [0], [0], [1], [0, 0, 1, 1], [], []>} : vector<4x4xbf16>, vector<4x16xbf16>, vector<4x16xf32> -> vector<4x16xf32>
    %77 = tpu.concatenate %55, %76 in 1 : vector<4x16xf32>, vector<4x16xf32> -> vector<4x32xf32>
    %78 = arith.truncf %77 : vector<4x32xf32> to vector<4x32xbf16>
    %c0_25 = arith.constant 0 : index
    %c0_26 = arith.constant 0 : index
    %79 = vector.load %arg6[%c0_25, %c0_26] : memref<32x32xbf16, #tpu.memory_space<vmem>>, vector<32x32xbf16>
    %cst_27 = arith.constant dense<0.000000e+00> : vector<4x32xf32>
    %80 = tpu.matmul %78, %79, %cst_27 {dimension_numbers = #tpu.dot_dimension_numbers<[1], [0], [0], [1], [0, 0, 1, 1], [], []>} : vector<4x32xbf16>, vector<32x32xbf16>, vector<4x32xf32> -> vector<4x32xf32>
    %c0_28 = arith.constant 0 : index
    %c0_29 = arith.constant 0 : index
    %81 = vector.load %arg7[%c0_28, %c0_29] : memref<1x32xf32, #tpu.memory_space<vmem>>, vector<1x32xf32>
    %82 = vector.broadcast %81 : vector<1x32xf32> to vector<4x32xf32>
    %83 = arith.addf %80, %82 : vector<4x32xf32>
    %84 = arith.addf %1, %83 : vector<4x32xf32>
    %c0_30 = arith.constant 0 : index
    %c0_31 = arith.constant 0 : index
    %85 = vector.load %arg8[%c0_30, %c0_31] : memref<1x32xf32, #tpu.memory_space<vmem>>, vector<1x32xf32>
    %c0_32 = arith.constant 0 : index
    %c0_33 = arith.constant 0 : index
    %86 = vector.load %arg9[%c0_32, %c0_33] : memref<1x32xf32, #tpu.memory_space<vmem>>, vector<1x32xf32>
    %cst_34 = arith.constant dense<0.000000e+00> : vector<4xf32>
    %87 = vector.multi_reduction <add>, %84, %cst_34 [1] : vector<4x32xf32> to vector<4xf32>
    %88 = vector.shape_cast %87 : vector<4xf32> to vector<4x1xf32>
    %cst_35 = arith.constant 3.200000e+01 : f32
    %89 = vector.broadcast %cst_35 : f32 to vector<4x1xf32>
    %90 = arith.divf %88, %89 : vector<4x1xf32>
    %91 = vector.broadcast %90 : vector<4x1xf32> to vector<4x32xf32>
    %92 = arith.subf %84, %91 : vector<4x32xf32>
    %93 = arith.mulf %92, %92 : vector<4x32xf32>
    %cst_36 = arith.constant dense<0.000000e+00> : vector<4xf32>
    %94 = vector.multi_reduction <add>, %93, %cst_36 [1] : vector<4x32xf32> to vector<4xf32>
    %95 = vector.shape_cast %94 : vector<4xf32> to vector<4x1xf32>
    %cst_37 = arith.constant 3.200000e+01 : f32
    %96 = vector.broadcast %cst_37 : f32 to vector<4x1xf32>
    %97 = arith.divf %95, %96 : vector<4x1xf32>
    %98 = vector.broadcast %90 : vector<4x1xf32> to vector<4x32xf32>
    %99 = arith.subf %84, %98 : vector<4x32xf32>
    %cst_38 = arith.constant 9.99999974E-6 : f32
    %100 = vector.broadcast %cst_38 : f32 to vector<4x1xf32>
    %101 = arith.addf %97, %100 : vector<4x1xf32>
    %102 = math.rsqrt %101 : vector<4x1xf32>
    %103 = vector.broadcast %102 : vector<4x1xf32> to vector<4x32xf32>
    %104 = arith.mulf %99, %103 : vector<4x32xf32>
    %105 = vector.broadcast %85 : vector<1x32xf32> to vector<4x32xf32>
    %106 = arith.mulf %104, %105 : vector<4x32xf32>
    %107 = vector.broadcast %86 : vector<1x32xf32> to vector<4x32xf32>
    %108 = arith.addf %106, %107 : vector<4x32xf32>
    %109 = arith.truncf %108 : vector<4x32xf32> to vector<4x32xbf16>
    %c0_39 = arith.constant 0 : index
    %c0_40 = arith.constant 0 : index
    %110 = vector.load %arg10[%c0_39, %c0_40] : memref<32x128xbf16, #tpu.memory_space<vmem>>, vector<32x128xbf16>
    %cst_41 = arith.constant dense<0.000000e+00> : vector<4x128xf32>
    %111 = tpu.matmul %109, %110, %cst_41 {dimension_numbers = #tpu.dot_dimension_numbers<[1], [0], [0], [1], [0, 0, 1, 1], [], []>} : vector<4x32xbf16>, vector<32x128xbf16>, vector<4x128xf32> -> vector<4x128xf32>
    %c0_42 = arith.constant 0 : index
    %c0_43 = arith.constant 0 : index
    %112 = vector.load %arg11[%c0_42, %c0_43] : memref<1x128xf32, #tpu.memory_space<vmem>>, vector<1x128xf32>
    %113 = vector.broadcast %112 : vector<1x128xf32> to vector<4x128xf32>
    %114 = arith.addf %111, %113 : vector<4x128xf32>
    %115 = arith.mulf %114, %114 : vector<4x128xf32>
    %116 = arith.mulf %114, %115 : vector<4x128xf32>
    %cst_44 = arith.constant 4.471500e-02 : f32
    %117 = vector.broadcast %cst_44 : f32 to vector<4x128xf32>
    %118 = arith.mulf %117, %116 : vector<4x128xf32>
    %119 = arith.addf %114, %118 : vector<4x128xf32>
    %cst_45 = arith.constant 0.797884583 : f32
    %120 = vector.broadcast %cst_45 : f32 to vector<4x128xf32>
    %121 = arith.mulf %120, %119 : vector<4x128xf32>
    %122 = math.tanh %121 : vector<4x128xf32>
    %cst_46 = arith.constant 1.000000e+00 : f32
    %123 = vector.broadcast %cst_46 : f32 to vector<4x128xf32>
    %124 = arith.addf %123, %122 : vector<4x128xf32>
    %cst_47 = arith.constant 5.000000e-01 : f32
    %125 = vector.broadcast %cst_47 : f32 to vector<4x128xf32>
    %126 = arith.mulf %125, %124 : vector<4x128xf32>
    %127 = arith.mulf %114, %126 : vector<4x128xf32>
    %128 = arith.truncf %127 : vector<4x128xf32> to vector<4x128xbf16>
    %c0_48 = arith.constant 0 : index
    %c0_49 = arith.constant 0 : index
    %129 = vector.load %arg12[%c0_48, %c0_49] : memref<128x64xbf16, #tpu.memory_space<vmem>>, vector<128x64xbf16>
    %cst_50 = arith.constant dense<0.000000e+00> : vector<4x64xf32>
    %130 = tpu.matmul %128, %129, %cst_50 {dimension_numbers = #tpu.dot_dimension_numbers<[1], [0], [0], [1], [0, 0, 1, 1], [], []>} : vector<4x128xbf16>, vector<128x64xbf16>, vector<4x64xf32> -> vector<4x64xf32>
    %c0_51 = arith.constant 0 : index
    %c0_52 = arith.constant 0 : index
    %131 = vector.load %arg13[%c0_51, %c0_52] : memref<1x64xf32, #tpu.memory_space<vmem>>, vector<1x64xf32>
    %132 = vector.broadcast %131 : vector<1x64xf32> to vector<4x64xf32>
    %133 = arith.addf %130, %132 : vector<4x64xf32>
    %134 = arith.truncf %108 : vector<4x32xf32> to vector<4x32xbf16>
    %c0_53 = arith.constant 0 : index
    %c0_54 = arith.constant 0 : index
    %135 = vector.load %arg14[%c0_53, %c0_54] : memref<32x64xbf16, #tpu.memory_space<vmem>>, vector<32x64xbf16>
    %cst_55 = arith.constant dense<0.000000e+00> : vector<4x64xf32>
    %136 = tpu.matmul %134, %135, %cst_55 {dimension_numbers = #tpu.dot_dimension_numbers<[1], [0], [0], [1], [0, 0, 1, 1], [], []>} : vector<4x32xbf16>, vector<32x64xbf16>, vector<4x64xf32> -> vector<4x64xf32>
    %c0_56 = arith.constant 0 : index
    %c0_57 = arith.constant 0 : index
    %137 = vector.load %arg15[%c0_56, %c0_57] : memref<1x64xf32, #tpu.memory_space<vmem>>, vector<1x64xf32>
    %138 = vector.broadcast %137 : vector<1x64xf32> to vector<4x64xf32>
    %139 = arith.addf %136, %138 : vector<4x64xf32>
    %140 = arith.addf %139, %133 : vector<4x64xf32>
    %c0_58 = arith.constant 0 : index
    %c0_59 = arith.constant 0 : index
    %c0_60 = arith.constant 0 : index
    %141 = vector.load %arg16[%c0_58, %c0_59, %c0_60] : memref<1x4x64xf32, #tpu.memory_space<vmem>>, vector<1x4x64xf32>
    %142 = vector.shape_cast %141 : vector<1x4x64xf32> to vector<4x64xf32>
    %143 = vector.shape_cast %140 : vector<4x64xf32> to vector<1x4x64xf32>
    tpu.vector_store %arg16[%c0_58, %c0_59, %c0_60], %143 {strides = array<i32>} : memref<1x4x64xf32, #tpu.memory_space<vmem>>, vector<1x4x64xf32>,
    return
  }
  func.func @transform_0(%arg0: i32) -> (i32, i32, i32) {
    %c0_i32 = arith.constant 0 : i32
    %c0_i32_0 = arith.constant 0 : i32
    %c0_i32_1 = arith.constant 0 : i32
    return %arg0, %c0_i32, %c0_i32_0 : i32, i32, i32
  }
  func.func @transform_1(%arg0: i32) -> (i32, i32) {
    %c0_i32 = arith.constant 0 : i32
    %c0_i32_0 = arith.constant 0 : i32
    %c0_i32_1 = arith.constant 0 : i32
    return %c0_i32, %c0_i32_0 : i32, i32
  }
  func.func @transform_2(%arg0: i32) -> (i32, i32) {
    %c0_i32 = arith.constant 0 : i32
    %c0_i32_0 = arith.constant 0 : i32
    %c0_i32_1 = arith.constant 0 : i32
    return %c0_i32, %c0_i32_0 : i32, i32
  }
  func.func @transform_3(%arg0: i32) -> (i32, i32) {
    %c0_i32 = arith.constant 0 : i32
    %c0_i32_0 = arith.constant 0 : i32
    %c0_i32_1 = arith.constant 0 : i32
    return %c0_i32, %c0_i32_0 : i32, i32
  }
  func.func @transform_4(%arg0: i32) -> (i32, i32) {
    %c0_i32 = arith.constant 0 : i32
    %c0_i32_0 = arith.constant 0 : i32
    %c0_i32_1 = arith.constant 0 : i32
    return %c0_i32, %c0_i32_0 : i32, i32
  }
  func.func @transform_5(%arg0: i32) -> (i32, i32) {
    %c0_i32 = arith.constant 0 : i32
    %c0_i32_0 = arith.constant 0 : i32
    %c0_i32_1 = arith.constant 0 : i32
    return %c0_i32, %c0_i32_0 : i32, i32
  }
  func.func @transform_6(%arg0: i32) -> (i32, i32) {
    %c0_i32 = arith.constant 0 : i32
    %c0_i32_0 = arith.constant 0 : i32
    %c0_i32_1 = arith.constant 0 : i32
    return %c0_i32, %c0_i32_0 : i32, i32
  }
  func.func @transform_7(%arg0: i32) -> (i32, i32) {
    %c0_i32 = arith.constant 0 : i32
    %c0_i32_0 = arith.constant 0 : i32
    %c0_i32_1 = arith.constant 0 : i32
    return %c0_i32, %c0_i32_0 : i32, i32
  }
  func.func @transform_8(%arg0: i32) -> (i32, i32) {
    %c0_i32 = arith.constant 0 : i32
    %c0_i32_0 = arith.constant 0 : i32
    %c0_i32_1 = arith.constant 0 : i32
    return %c0_i32, %c0_i32_0 : i32, i32
  }
  func.func @transform_9(%arg0: i32) -> (i32, i32) {
    %c0_i32 = arith.constant 0 : i32
    %c0_i32_0 = arith.constant 0 : i32
    %c0_i32_1 = arith.constant 0 : i32
    return %c0_i32, %c0_i32_0 : i32, i32
  }
  func.func @transform_10(%arg0: i32) -> (i32, i32) {
    %c0_i32 = arith.constant 0 : i32
    %c0_i32_0 = arith.constant 0 : i32
    %c0_i32_1 = arith.constant 0 : i32
    return %c0_i32, %c0_i32_0 : i32, i32
  }
  func.func @transform_11(%arg0: i32) -> (i32, i32) {
    %c0_i32 = arith.constant 0 : i32
    %c0_i32_0 = arith.constant 0 : i32
    %c0_i32_1 = arith.constant 0 : i32
    return %c0_i32, %c0_i32_0 : i32, i32
  }
  func.func @transform_12(%arg0: i32) -> (i32, i32) {
    %c0_i32 = arith.constant 0 : i32
    %c0_i32_0 = arith.constant 0 : i32
    %c0_i32_1 = arith.constant 0 : i32
    return %c0_i32, %c0_i32_0 : i32, i32
  }
  func.func @transform_13(%arg0: i32) -> (i32, i32) {
    %c0_i32 = arith.constant 0 : i32
    %c0_i32_0 = arith.constant 0 : i32
    %c0_i32_1 = arith.constant 0 : i32
    return %c0_i32, %c0_i32_0 : i32, i32
  }
  func.func @transform_14(%arg0: i32) -> (i32, i32) {
    %c0_i32 = arith.constant 0 : i32
    %c0_i32_0 = arith.constant 0 : i32
    %c0_i32_1 = arith.constant 0 : i32
    return %c0_i32, %c0_i32_0 : i32, i32
  }
  func.func @transform_15(%arg0: i32) -> (i32, i32, i32) {
    %c0_i32 = arith.constant 0 : i32
    %c0_i32_0 = arith.constant 0 : i32
    %c0_i32_1 = arith.constant 0 : i32
    return %arg0, %c0_i32, %c0_i32_0 : i32, i32, i32
  }
}

module attributes {stable_mosaic.version = 11 : i64} {
  func.func @_head_kernel(%arg0: i32, %arg1: memref<1x4x64xf32, #tpu.memory_space<vmem>>, %arg2: memref<1x64xf32, #tpu.memory_space<vmem>>, %arg3: memref<1x64xf32, #tpu.memory_space<vmem>>, %arg4: memref<64x10xbf16, #tpu.memory_space<vmem>>, %arg5: memref<1x10xf32, #tpu.memory_space<vmem>>, %arg6: memref<1x1x10xf32, #tpu.memory_space<vmem>>) attributes {dimension_semantics = [#tpu.dimension_semantics<parallel>], iteration_bounds = array<i64: 2>, scalar_prefetch = 0 : i64, scratch_operands = 0 : i64, tpu.core_type = #tpu.core_type<tc>, window_params = [{transform_indices = @transform_0, window_bounds = array<i64: 1, 4, 64>}, {pipeline_mode = #tpu.pipeline_mode<synchronous>, transform_indices = @transform_1, window_bounds = array<i64: 1, 64>}, {pipeline_mode = #tpu.pipeline_mode<synchronous>, transform_indices = @transform_2, window_bounds = array<i64: 1, 64>}, {pipeline_mode = #tpu.pipeline_mode<synchronous>, transform_indices = @transform_3, window_bounds = array<i64: 64, 10>}, {pipeline_mode = #tpu.pipeline_mode<synchronous>, transform_indices = @transform_4, window_bounds = array<i64: 1, 10>}, {transform_indices = @transform_5, window_bounds = array<i64: 1, 1, 10>}]} {
    %c0 = arith.constant 0 : index
    %c0_0 = arith.constant 0 : index
    %c0_1 = arith.constant 0 : index
    %0 = vector.load %arg1[%c0, %c0_0, %c0_1] : memref<1x4x64xf32, #tpu.memory_space<vmem>>, vector<1x4x64xf32>
    %1 = vector.shape_cast %0 : vector<1x4x64xf32> to vector<4x64xf32>
    %c0_2 = arith.constant 0 : index
    %c0_3 = arith.constant 0 : index
    %2 = vector.load %arg2[%c0_2, %c0_3] : memref<1x64xf32, #tpu.memory_space<vmem>>, vector<1x64xf32>
    %c0_4 = arith.constant 0 : index
    %c0_5 = arith.constant 0 : index
    %3 = vector.load %arg3[%c0_4, %c0_5] : memref<1x64xf32, #tpu.memory_space<vmem>>, vector<1x64xf32>
    %cst = arith.constant dense<0.000000e+00> : vector<4xf32>
    %4 = vector.multi_reduction <add>, %1, %cst [1] : vector<4x64xf32> to vector<4xf32>
    %5 = vector.shape_cast %4 : vector<4xf32> to vector<4x1xf32>
    %cst_6 = arith.constant 6.400000e+01 : f32
    %6 = vector.broadcast %cst_6 : f32 to vector<4x1xf32>
    %7 = arith.divf %5, %6 : vector<4x1xf32>
    %8 = vector.broadcast %7 : vector<4x1xf32> to vector<4x64xf32>
    %9 = arith.subf %1, %8 : vector<4x64xf32>
    %10 = arith.mulf %9, %9 : vector<4x64xf32>
    %cst_7 = arith.constant dense<0.000000e+00> : vector<4xf32>
    %11 = vector.multi_reduction <add>, %10, %cst_7 [1] : vector<4x64xf32> to vector<4xf32>
    %12 = vector.shape_cast %11 : vector<4xf32> to vector<4x1xf32>
    %cst_8 = arith.constant 6.400000e+01 : f32
    %13 = vector.broadcast %cst_8 : f32 to vector<4x1xf32>
    %14 = arith.divf %12, %13 : vector<4x1xf32>
    %15 = vector.broadcast %7 : vector<4x1xf32> to vector<4x64xf32>
    %16 = arith.subf %1, %15 : vector<4x64xf32>
    %cst_9 = arith.constant 9.99999974E-6 : f32
    %17 = vector.broadcast %cst_9 : f32 to vector<4x1xf32>
    %18 = arith.addf %14, %17 : vector<4x1xf32>
    %19 = math.rsqrt %18 : vector<4x1xf32>
    %20 = vector.broadcast %19 : vector<4x1xf32> to vector<4x64xf32>
    %21 = arith.mulf %16, %20 : vector<4x64xf32>
    %22 = vector.broadcast %2 : vector<1x64xf32> to vector<4x64xf32>
    %23 = arith.mulf %21, %22 : vector<4x64xf32>
    %24 = vector.broadcast %3 : vector<1x64xf32> to vector<4x64xf32>
    %25 = arith.addf %23, %24 : vector<4x64xf32>
    %cst_10 = arith.constant dense<0.000000e+00> : vector<64xf32>
    %26 = vector.multi_reduction <add>, %25, %cst_10 [0] : vector<4x64xf32> to vector<64xf32>
    %27 = vector.shape_cast %26 : vector<64xf32> to vector<1x64xf32>
    %cst_11 = arith.constant 4.000000e+00 : f32
    %28 = vector.broadcast %cst_11 : f32 to vector<1x64xf32>
    %29 = arith.divf %27, %28 : vector<1x64xf32>
    %30 = arith.truncf %29 : vector<1x64xf32> to vector<1x64xbf16>
    %c0_12 = arith.constant 0 : index
    %c0_13 = arith.constant 0 : index
    %31 = vector.load %arg4[%c0_12, %c0_13] : memref<64x10xbf16, #tpu.memory_space<vmem>>, vector<64x10xbf16>
    %cst_14 = arith.constant dense<0.000000e+00> : vector<1x10xf32>
    %32 = tpu.matmul %30, %31, %cst_14 {dimension_numbers = #tpu.dot_dimension_numbers<[1], [0], [0], [1], [0, 0, 1, 1], [], []>} : vector<1x64xbf16>, vector<64x10xbf16>, vector<1x10xf32> -> vector<1x10xf32>
    %c0_15 = arith.constant 0 : index
    %c0_16 = arith.constant 0 : index
    %33 = vector.load %arg5[%c0_15, %c0_16] : memref<1x10xf32, #tpu.memory_space<vmem>>, vector<1x10xf32>
    %34 = arith.addf %32, %33 : vector<1x10xf32>
    %c0_17 = arith.constant 0 : index
    %c0_18 = arith.constant 0 : index
    %c0_19 = arith.constant 0 : index
    %35 = vector.load %arg6[%c0_17, %c0_18, %c0_19] : memref<1x1x10xf32, #tpu.memory_space<vmem>>, vector<1x1x10xf32>
    %36 = vector.shape_cast %35 : vector<1x1x10xf32> to vector<1x10xf32>
    %37 = vector.shape_cast %34 : vector<1x10xf32> to vector<1x1x10xf32>
    tpu.vector_store %arg6[%c0_17, %c0_18, %c0_19], %37 {strides = array<i32>} : memref<1x1x10xf32, #tpu.memory_space<vmem>>, vector<1x1x10xf32>,
    return
  }
  func.func @transform_0(%arg0: i32) -> (i32, i32, i32) {
    %c0_i32 = arith.constant 0 : i32
    %c0_i32_0 = arith.constant 0 : i32
    %c0_i32_1 = arith.constant 0 : i32
    return %arg0, %c0_i32, %c0_i32_0 : i32, i32, i32
  }
  func.func @transform_1(%arg0: i32) -> (i32, i32) {
    %c0_i32 = arith.constant 0 : i32
    %c0_i32_0 = arith.constant 0 : i32
    %c0_i32_1 = arith.constant 0 : i32
    return %c0_i32, %c0_i32_0 : i32, i32
  }
  func.func @transform_2(%arg0: i32) -> (i32, i32) {
    %c0_i32 = arith.constant 0 : i32
    %c0_i32_0 = arith.constant 0 : i32
    %c0_i32_1 = arith.constant 0 : i32
    return %c0_i32, %c0_i32_0 : i32, i32
  }
  func.func @transform_3(%arg0: i32) -> (i32, i32) {
    %c0_i32 = arith.constant 0 : i32
    %c0_i32_0 = arith.constant 0 : i32
    %c0_i32_1 = arith.constant 0 : i32
    return %c0_i32, %c0_i32_0 : i32, i32
  }
  func.func @transform_4(%arg0: i32) -> (i32, i32) {
    %c0_i32 = arith.constant 0 : i32
    %c0_i32_0 = arith.constant 0 : i32
    %c0_i32_1 = arith.constant 0 : i32
    return %c0_i32, %c0_i32_0 : i32, i32
  }
  func.func @transform_5(%arg0: i32) -> (i32, i32, i32) {
    %c0_i32 = arith.constant 0 : i32
    %c0_i32_0 = arith.constant 0 : i32
    %c0_i32_1 = arith.constant 0 : i32
    return %arg0, %c0_i32, %c0_i32_0 : i32, i32, i32
  }
}

</mosaic_0001>

<bundles_post_ra>
// kernel: enhanced_mvit_forward.4
= control target key start
LH: loop header
LB: loop body
LE: loop exit
PB: predicated region body
PF: predicated region fallthrough
CT: control target
= control target key end

     0   :  { %s918_s15 = smov 0   ;;  %s1067_s0 = inlined_call_operand.vmem [shape: bf16[2,16,576], index: 0, kind: input, shape index: {}]   ;;  %s1068_s1 = inlined_call_operand.vmem [shape: bf16[576,32], index: 1, kind: input, shape index: {}]   ;;  %s1069_s2 = inlined_call_operand.vmem [shape: f32[1,32], index: 2, kind: input, shape index: {}]   ;;  %s1070_s3 = inlined_call_operand.vmem [shape: f32[16,32], index: 3, kind: input, shape index: {}]   ;;  %s1071_s4 = inlined_call_operand.vmem [shape: f32[2,16,32], index: 4, kind: output, shape index: {}]  }
   0x1 LB: > { %s714_s16 = sadd.s32 4294967295, %s889_s15   ;;  %p718_p0 = scmp.ge.s32.totalorder %s889_s15, 1  ;;  %s889_s15 = sphi %s918_s15, %s14_s15  }
   0x2   : > { %p162_p1 = scmp.lt.s32.totalorder %s889_s15, 3 }
   0x4   : > { %p163_p2 = pnand %p718_p0, %p162_p1 }
   0x5   : > { %v840_v0 = vld [vmem:[%s1068_s1 + $0x40] sm:$0xff] (!%p163_p2)   ;;  %v844_v4 = vld [vmem:[%s1068_s1 + $0x48] sm:$0xff] (!%p163_p2)   ;;  %v848_v8 = vld [vmem:[%s1068_s1 + $0x50] sm:$0xff] (!%p163_p2)   ;;  %p188_p3 = scmp.lt.s32.totalorder (!%p163_p2), %s714_s16, 1  ;;  %v891_v33 = vmov (!%p163_p2), 0.0   ;;  %vm892_vm0 = vmmov (!%p163_p2), 0  }
   0x6   : > { %166 = sbr.rel (%p163_p2) target bundleno = 273 (0x111), region = 36  ;;  %v841_v1 = vld [vmem:[%s1068_s1] sm:$0xff] (!%p163_p2)   ;;  %768 = vmatprep.subr.bf16.mxu0 (!%p163_p2), %v840_v0  ;;  %v845_v5 = vld [vmem:[%s1068_s1 + $0x8] sm:$0xff] (!%p163_p2)   ;;  %v849_v9 = vld [vmem:[%s1068_s1 + $0x10] sm:$0xff] (!%p163_p2)   ;;  %vm525_vm1 = vcmask (!%p163_p2), 523264   ;;  %vm656_vm2 = vcmask (!%p163_p2), 261120  }
   0x7   : > { %v842_v2 = vld [vmem:[%s1068_s1 + $0xc0] sm:$0xff] (!%p163_p2)   ;;  %769 = vmatpush3.bf16.msra.mxu0 (!%p163_p2), %v841_v1  ;;  %v846_v6 = vld [vmem:[%s1068_s1 + $0xc8] sm:$0xff] (!%p163_p2)   ;;  %v850_v10 = vld [vmem:[%s1068_s1 + $0xd0] sm:$0xff] (!%p163_p2)  }
   0x8   : > { %v843_v3 = vld [vmem:[%s1068_s1 + $0x80] sm:$0xff] (!%p163_p2)   ;;  %790 = vmatprep.subr.bf16.mxu1 (!%p163_p2), %v842_v2  ;;  %770 = vmatprep.subr.bf16.mxu0 (!%p163_p2), %v844_v4  ;;  %v847_v7 = vld [vmem:[%s1068_s1 + $0x88] sm:$0xff] (!%p163_p2)   ;;  %v851_v11 = vld [vmem:[%s1068_s1 + $0x90] sm:$0xff] (!%p163_p2)  }
   0x9   : > { %791 = vmatpush3.bf16.msra.mxu1 (!%p163_p2), %v843_v3  ;;  %v852_v12 = vld [vmem:[%s1068_s1 + $0x58] sm:$0xff] (!%p163_p2)   ;;  %v856_v16 = vld [vmem:[%s1068_s1 + $0x60] sm:$0xff] (!%p163_p2)   ;;  %v860_v20 = vld [vmem:[%s1068_s1 + $0x68] sm:$0xff] (!%p163_p2)  }
   0xa   : > { %792 = vmatprep.subr.bf16.mxu1 (!%p163_p2), %v846_v6  ;;  %v853_v13 = vld [vmem:[%s1068_s1 + $0x18] sm:$0xff] (!%p163_p2)   ;;  %v857_v17 = vld [vmem:[%s1068_s1 + $0x20] sm:$0xff] (!%p163_p2)   ;;  %v861_v21 = vld [vmem:[%s1068_s1 + $0x28] sm:$0xff] (!%p163_p2)  }
   0xb   : > { %771 = vmatpush3.bf16.msra.mxu0 (!%p163_p2), %v845_v5  ;;  %v854_v14 = vld [vmem:[%s1068_s1 + $0xd8] sm:$0xff] (!%p163_p2)   ;;  %v858_v18 = vld [vmem:[%s1068_s1 + $0xe0] sm:$0xff] (!%p163_p2)   ;;  %v862_v22 = vld [vmem:[%s1068_s1 + $0xe8] sm:$0xff] (!%p163_p2)  }
   0xc   : > { %772 = vmatprep.subr.bf16.mxu0 (!%p163_p2), %v848_v8  ;;  %v855_v15 = vld [vmem:[%s1068_s1 + $0x98] sm:$0xff] (!%p163_p2)   ;;  %v859_v19 = vld [vmem:[%s1068_s1 + $0xa0] sm:$0xff] (!%p163_p2)   ;;  %v863_v23 = vld [vmem:[%s1068_s1 + $0xa8] sm:$0xff] (!%p163_p2)  }
   0xd   : > { %793 = vmatpush3.bf16.msra.mxu1 %v847_v7  ;;  %s1073_s16 = smov (!%p188_p3, %s714_s16), 1  ;;  %v864_v24 = vld [vmem:[%s1068_s1 + $0x70] sm:$0xff]   ;;  %v868_v28 = vld [vmem:[%s1068_s1 + $0x78] sm:$0xff]   ;;  %v878_v37 = vld [vmem:[%s1068_s1 + $0x100] sm:$0xff]  }
   0xe   : > { %794 = vmatprep.subr.bf16.mxu1 %v850_v10  ;;  %s829_s19 = smul.u32 40, %s1073_s16  ;;  %v865_v25 = vld [vmem:[%s1068_s1 + $0x30] sm:$0xff]   ;;  %v869_v29 = vld [vmem:[%s1068_s1 + $0x38] sm:$0xff]   ;;  %v879_v38 = vld [vmem:[%s1068_s1 + $0x108] sm:$0xff]   ;;  %s767_s23 = sshll.u32 %s1073_s16, 4 }
   0xf   : > { %773 = vmatpush3.bf16.msra.mxu0 %v849_v9  ;;  %v866_v26 = vld [vmem:[%s1068_s1 + $0xf0] sm:$0xff]   ;;  %v870_v30 = vld [vmem:[%s1068_s1 + $0xf8] sm:$0xff]   ;;  %v722_v43 = vld [vmem:[%s1069_s2] ss:$0 sm:$0xff]  ;;  %s197_s28 = scalar_lea.vmem %s1071_s4, %s767_s23 }
  0x10   : > { %774 = vmatprep.subr.bf16.mxu0 %v852_v12  ;;  %v867_v27 = vld [vmem:[%s1068_s1 + $0xb0] sm:$0xff]   ;;  %s1023_s30 = scalar_lea.vmem %s1067_s0, %s829_s19  ;;  %v874_v34 = vld [vmem:[%s1068_s1 + $0xb8] sm:$0xff]   ;;  %v652_v60 = vld [vmem:[%s1070_s3] sm:$0xff] }
  0x11   : > { %795 = vmatpush3.bf16.msra.mxu1 %v851_v11  ;;  %v871_v31 = vld [vmem:[%s1023_s30] ss:$20 sps:$4 sm:$0xff]   ;;  %v873_v32 = vld [vmem:[%s1023_s30 + $0x4] ss:$20 sps:$4 sm:$0xff]   ;;  %v875_v35 = vld [vmem:[%s1023_s30 + $0x8] ss:$20 sps:$4 sm:$0xff]  }
  0x12   : > { %796 = vmatprep.subr.bf16.mxu1 %v854_v14  ;;  %561 = vmatprep.mubr.bf16.mxu0 %v873_v32  ;;  %v877_v36 = vld [vmem:[%s1023_s30 + $0xc] ss:$20 sps:$4 sm:$0xff]   ;;  %v880_v39 = vld [vmem:[%s1068_s1 + $0x110] sm:$0xff]   ;;  %v881_v40 = vld [vmem:[%s1068_s1 + $0x118] sm:$0xff]  }
  0x13   : > { %775 = vmatpush3.bf16.msra.mxu0 %v853_v13  ;;  %602 = vmatprep.mubr.bf16.mxu1 %v877_v36  ;;  %v882_v41 = vld [vmem:[%s1023_s30 + $0x10] ss:$20 sps:$4 sm:$0xff]   ;;  %v653_v0 = vld [vmem:[%s1070_s3 + $0x8] sm:$0xff] }
  0x14   : > { %776 = vmatprep.subr.bf16.mxu0 %v856_v16 }
  0x15   : > { %797 = vmatpush3.bf16.msra.mxu1 %v855_v15 }
  0x16   : > { %798 = vmatprep.subr.bf16.mxu1 %v858_v18 }
  0x17   : > { %777 = vmatpush3.bf16.msra.mxu0 %v857_v17 }
  0x18   : > { %778 = vmatprep.subr.bf16.mxu0 %v860_v20 }
  0x19   : > { %799 = vmatpush3.bf16.msra.mxu1 %v859_v19 }
  0x1a   : > { %800 = vmatprep.subr.bf16.mxu1 %v862_v22 }
  0x1b   : > { %779 = vmatpush3.bf16.msra.mxu0 %v861_v21 }
  0x1c   : > { %780 = vmatprep.subr.bf16.mxu0 %v864_v24 }
  0x1d   : > { %801 = vmatpush3.bf16.msra.mxu1 %v863_v23 }
  0x1e   : > { %802 = vmatprep.subr.bf16.mxu1 %v866_v26 }
  0x1f   : > { %781 = vmatpush3.bf16.msra.mxu0 %v865_v25 }
  0x20   : > { %782 = vmatprep.subr.bf16.mxu0 %v868_v28 }
  0x21   : > { %803 = vmatpush3.bf16.msra.mxu1 %v867_v27 }
  0x22   : > { %804 = vmatprep.subr.bf16.mxu1 %v870_v30 }
  0x23   : > { %783 = vmatpush3.bf16.msra.mxu0 %v869_v29 }
  0x24   : > { %817 = vmatprep.subr.bf16.mxu0 %v891_v33 }
  0x25   : > { %805 = vmatpush3.bf16.msra.mxu1 %v874_v34 }
  0x26   : > { %562 = vmatmul.mubr.bf16.vlgmr.msra.gmra.mrb[0].mxu0 %v871_v31 }
  0x27   : > { %825 = vmatprep.mubr.msk.bf16.mxu0 %vm892_vm0, %v891_v33  ;;  %818 = vmatpush3.bf16.msra.mxu0 %v878_v37 }
  0x28   : > { %603 = vmatmul.mubr.bf16.vlgmr.msra.gmra.mrb[0].mxu1 %v875_v35  ;;  %819 = vmatprep.subr.bf16.mxu0 %v891_v33 }
  0x2b   : > { %820 = vmatpush3.bf16.msra.mxu0 %v879_v38 }
  0x2c   : > { %821 = vmatprep.subr.bf16.mxu0 %v891_v33 }
  0x2f   : > { %822 = vmatpush3.bf16.msra.mxu0 %v880_v39 }
  0x30   : > { %823 = vmatprep.subr.bf16.mxu0 %v891_v33 }
  0x33   : > { %824 = vmatpush3.bf16.msra.mxu0 %v881_v40 }
  0x36   : > { %826 = vmatmul.mubr.msk.bf16.vlgmr.msra.gmra.mrb[4].mxu0 %vm525_vm1, %v882_v41 }
  0xf9   : > { %v784_v42 = vpop.f32.mrb[0].mxu0 }
  0xfa   : > { %v785_v44 = vpop.f32.mrb[1].mxu0 }
  0xfb   : > { %v786_v45 = vadd.f32 %v785_v44, %v784_v42  ;;  %v787_v46 = vpop.f32.mrb[2].mxu0  ;;  %v806_v47 = vpop.f32.mrb[0].mxu1 }
  0xfc   : > { %v788_v48 = vpop.f32.mrb[3].mxu0  ;;  %v807_v51 = vpop.f32.mrb[1].mxu1 }
  0xfd   : > { %v564_v49 = vadd.f32 %v786_v45, %v722_v43  ;;  %v789_v50 = vadd.f32 %v788_v48, %v787_v46  ;;  %v808_v52 = vadd.f32 %v807_v51, %v806_v47  ;;  %v809_v53 = vpop.f32.mrb[2].mxu1 }
  0xfe   : > { %v810_v55 = vpop.f32.mrb[3].mxu1 }
  0xff   : > { %v567_v54 = vadd.f32 %v789_v50, %v722_v43  ;;  %v811_v56 = vadd.f32 %v810_v55, %v809_v53  ;;  %v605_v57 = vadd.f32 %v808_v52, %v564_v49 }
 0x101   : > { %v608_v58 = vadd.f32 %v811_v56, %v567_v54 }
 0x109   : > { %v645_v59 = vpop.f32.mrb[4].mxu0 }
 0x10a   : > { %v646_v61 = vadd.f32 %v645_v59, %v605_v57  ;;  %v827_v62 = vpop.f32.mrb[5].mxu0 }
 0x10b   : > { %v648_v63 = vpop.f32.mrb[6].mxu0 }
 0x10c   : > { %v654_v1 = vadd.f32 %v652_v60, %v646_v61  ;;  %v649_v2 = vadd.f32 %v648_v63, %v608_v58  ;;  %v828_v3 = vpop.f32.mrb[7].mxu0 }
 0x10e   : > { %657 = vst.msk [vmem:[%s197_s28] sm:$0xff] %vm656_vm2, %v654_v1  ;;  %v655_v4 = vadd.f32 %v653_v0, %v649_v2 }
 0x110   : > { %658 = vst.msk [vmem:[%s197_s28 + $0x8] sm:$0xff] %vm656_vm2, %v655_v4 }
 0x111 PF: > { %s14_s15 = sadd.s32 1, %s889_s15  }
 0x112   : > { %p11_p4 = scmp.ge.s32.totalorder %s14_s15, 4  }
 0x114   :  { %13 = sbr.rel (!%p11_p4) target bundleno = 1 (0x1), region = 66 }

// kernel: enhanced_mvit_forward.5
= control target key start
LH: loop header
LB: loop body
LE: loop exit
PB: predicated region body
PF: predicated region fallthrough
CT: control target
= control target key end

     0   :  { %s1450_s29 = smov 0   ;;  %s1602_s0 = inlined_call_operand.vmem [shape: f32[2,16,32], index: 0, kind: input, shape index: {}]   ;;  %s1603_s1 = inlined_call_operand.vmem [shape: f32[4,16], index: 1, kind: input, shape index: {}]   ;;  %s1604_s2 = inlined_call_operand.vmem [shape: f32[1,32], index: 2, kind: input, shape index: {}]   ;;  %s1605_s3 = inlined_call_operand.vmem [shape: f32[1,32], index: 3, kind: input, shape index: {}]   ;;  %s1606_s4 = inlined_call_operand.vmem [shape: bf16[32,96], index: 4, kind: input, shape index: {}]   ;;  %s1607_s5 = inlined_call_operand.vmem [shape: f32[1,96], index: 5, kind: input, shape index: {}]   ;;  %s1608_s6 = inlined_call_operand.vmem [shape: bf16[32,32], index: 6, kind: input, shape index: {}]   ;;  %s1609_s7 = inlined_call_operand.vmem [shape: f32[1,32], index: 7, kind: input, shape index: {}]   ;;  %s1610_s8 = inlined_call_operand.vmem [shape: f32[1,32], index: 8, kind: input, shape index: {}]   ;;  %s1611_s9 = inlined_call_operand.vmem [shape: f32[1,32], index: 9, kind: input, shape index: {}]   ;;  %s1612_s10 = inlined_call_operand.vmem [shape: bf16[32,128], index: 10, kind: input, shape index: {}]   ;;  %s1613_s11 = inlined_call_operand.vmem [shape: f32[1,128], index: 11, kind: input, shape index: {}]   ;;  %s1614_s12 = inlined_call_operand.vmem [shape: bf16[128,32], index: 12, kind: input, shape index: {}]   ;;  %s1615_s13 = inlined_call_operand.vmem [shape: f32[1,32], index: 13, kind: input, shape index: {}]   ;;  %s1616_s14 = inlined_call_operand.vmem [shape: f32[2,4,32], index: 14, kind: output, shape index: {}]  }
   0x1 LB: > { %s1179_s30 = sadd.s32 4294967295, %s1368_s29   ;;  %p1183_p0 = scmp.ge.s32.totalorder %s1368_s29, 1  ;;  %s1368_s29 = sphi %s1450_s29, %s24_s29  }
   0x2   : > { %p412_p1 = scmp.lt.s32.totalorder %s1368_s29, 3 }
   0x4   : > { %p413_p2 = pnand %p1183_p0, %p412_p1 }
   0x5   : > { %p457_p3 = scmp.lt.s32.totalorder (!%p413_p2), %s1179_s30, 1  ;;  %vm471_vm0 = vcmask (!%p413_p2), 261120   ;;  %v1336_v14 = vld [vmem:[%s1606_s4] sm:$0xff] (!%p413_p2)   ;;  %v1370_v15 = vmov (!%p413_p2), 0.0   ;;  %v1337_v16 = vld [vmem:[%s1606_s4 + $0x8] sm:$0xff] (!%p413_p2)   ;;  %vm1371_vm1 = vmmov (!%p413_p2), 0  }
   0x6   : > { %416 = sbr.rel (%p413_p2) target bundleno = 2506 (0x9ca), region = 76  ;;  %1247 = vmatprep.subr.bf16.mxu1 (!%p413_p2), %v1370_v15  ;;  %1268 = vmatprep.subr.bf16.mxu0 (!%p413_p2), %v1370_v15  ;;  %v1187_v25 = vld [vmem:[%s1604_s2] ss:$0 sm:$0xff] (!%p413_p2)  ;;  %v1372_v34 = vmov (!%p413_p2), 0.0|0.0   ;;  %vm584_vm2 = vcmask (!%p413_p2), 130048   ;;  %vm710_vm3 = vcmask (!%p413_p2), 125952  }
   0x7   : > { %1248 = vmatpush3.bf16.msra.mxu1 (!%p413_p2), %v1336_v14  ;;  %1251 = vmatprep.mubr.msk.bf16.mxu1 (!%p413_p2), %vm1371_vm1, %v1370_v15  ;;  %v1188_v29 = vld [vmem:[%s1605_s3] ss:$0 sm:$0xff] (!%p413_p2)  ;;  %vm908_vm4 = vcmask (!%p413_p2), 257024  }
   0x8   : > { %1249 = vmatprep.subr.bf16.mxu1 (!%p413_p2), %v1370_v15  ;;  %1270 = vmatprep.mubr.msk.bf16.mxu0 (!%p413_p2), %vm1371_vm1, %v1370_v15  ;;  %v1189_v35 = vld [vmem:[%s1607_s5] ss:$0 sm:$0xff] (!%p413_p2) }
   0x9   : > { %v583_v43 = vld [vmem:[%s1603_s1] sm:$0xf] (!%p413_p2) }
   0xa   : > { %v1338_v60 = vld [vmem:[%s1608_s6] sm:$0xff] (!%p413_p2)  }
   0xb   : > { %1250 = vmatpush3.bf16.msra.mxu1 (!%p413_p2), %v1337_v16 }
   0xc   : > { %1317 = vmatprep.subr.bf16.mxu1 (!%p413_p2), %v1372_v34 }
   0xd   : > { %s1618_s30 = smov (!%p457_p3, %s1179_s30), 1 }
   0xe   : > { %s1218_s15 = sshll.u32 %s1618_s30, 4  ;;  %s1186_s25 = sshll.u32 %s1618_s30, 2 }
   0xf   : > { %s461_s18 = scalar_lea.vmem %s1602_s0, %s1218_s15  ;;  %s1373_s15 = smov 96  }
  0x10   : > { %v1464_v0 = vld [vmem:[%s461_s18] sm:$0xff]  ;;  %v1466_v1 = vld [vmem:[%s461_s18 + $0x8] sm:$0xff]  ;;  %s1374_s18 = smov 64   ;;  %s465_s28 = scalar_lea.vmem %s1616_s14, %s1186_s25 }
  0x11   : > { %v472_v2 = vsel %vm471_vm0, %v1464_v0, 0.0  ;;  %v475_v3 = vsel %vm471_vm0, %v1466_v1, 0.0 }
  0x12   : > { %473 = vadd.xlane.f32.xlu0 %v472_v2 }
  0x16   : > { %476 = vadd.xlane.f32.xlu0 %v475_v3  ;;  %v1321_v3 = vpack.c.bf16 %v1466_v1, %v1464_v0 }
  0x9f   : > { %v474_v4 = vpop.xlane.xlu0 %473 }
  0xa0   : > { %v479_v5 = vmul.f32 0.03125, %v474_v4 }
  0xa2   : > { %v481_v6 = vsub.f32 %v1464_v0, %v479_v5  ;;  %v1339_v5 = vld [vmem:[%s1608_s6 + $0x8] sm:$0xff]  }
  0xa3   : > { %v477_v7 = vpop.xlane.xlu0 %476 }
  0xa4   : > { %v480_v8 = vmul.f32 0.03125, %v477_v7  ;;  %v483_v9 = vmul.f32 %v481_v6, %v481_v6 }
  0xa6   : > { %v482_v10 = vsub.f32 %v1466_v1, %v480_v8  ;;  %v485_v11 = vsel %vm471_vm0, %v483_v9, 0.0 }
  0xa7   : > { %486 = vadd.xlane.f32.xlu1 %v485_v11  ;;  %v1196_v11 = vld [vmem:[%s1609_s7] ss:$0 sm:$0xff] }
  0xa8   : > { %v484_v12 = vmul.f32 %v482_v10, %v482_v10 }
  0xaa   : > { %v488_v13 = vsel %vm471_vm0, %v484_v12, 0.0 }
  0xab   : > { %489 = vadd.xlane.f32.xlu1 %v488_v13 }
 0x134   : > { %v487_v17 = vpop.xlane.xlu1 %486 }
 0x135   : > { %v491_v18 = vmul.f32 0.03125, %v487_v17 }
 0x137   : > { %v493_v19 = vadd.f32 1e-05, %v491_v18 }
 0x138   : > { %v490_v20 = vpop.xlane.xlu1 %489 }
 0x139   : > { %1350 = vrsqrt.f32 %v493_v19  ;;  %v492_v21 = vmul.f32 0.03125, %v490_v20 }
 0x13b   : > { %v494_v22 = vadd.f32 1e-05, %v492_v21 }
 0x13d   : > { %1352 = vrsqrt.f32 %v494_v22 }
 0x143   : > { %v1351_v23 = vpop.eup %1350 }
 0x144   : > { %v497_v24 = vmul.f32 %v1351_v23, %v481_v6 }
 0x146   : > { %v505_v28 = vmul.f32 %v1187_v25, %v497_v24 }
 0x147   : > { %v1353_v26 = vpop.eup %1352 }
 0x148   : > { %v498_v27 = vmul.f32 %v1353_v26, %v482_v10  ;;  %v513_v31 = vadd.f32 %v1188_v29, %v505_v28  ;;  %v1341_v26 = vld [vmem:[%s1612_s10 + $0x8] sm:$0xff]  }
 0x14a   : > { %v506_v30 = vmul.f32 %v1187_v25, %v498_v27  ;;  %v1340_v25 = vld [vmem:[%s1612_s10] sm:$0xff]  }
 0x14c   : > { %v514_v32 = vadd.f32 %v1188_v29, %v506_v30 }
 0x14e   : > { %v515_v33 = vpack.c.bf16 %v514_v32, %v513_v31  ;;  %v1201_v31 = vld [vmem:[%s1610_s8] ss:$0 sm:$0xff] }
 0x150   : > { %1252 = vmatmul.mubr.msk.bf16.vlgmr.msra.gmra.mrb[0].mxu1 %vm471_vm0, %v515_v33  ;;  %v1202_v33 = vld [vmem:[%s1611_s9] ss:$0 sm:$0xff] }
 0x151   : > { %1259 = vmatprep.mubr.msk.f32.mxu1 %vm1371_vm1, %v1370_v15 }
 0x223   : > { %v576_v36 = vpop.f32.mrb[0].mxu1 }
 0x224   : > { %v1253_v37 = vpop.f32.mrb[1].mxu1  ;;  %v577_v39 = vadd.f32 %v1189_v35, %v576_v36 }
 0x225   : > { %v579_v38 = vpop.f32.mrb[2].mxu1  ;;  %v1342_v37 = vld [vmem:[%s1614_s12] sm:$0xff]  }
 0x226   : > { %v580_v40 = vadd.f32 %v1189_v35, %v579_v38  ;;  %v1254_v41 = vpop.f32.mrb[3].mxu1  ;;  %v1343_v38 = vld [vmem:[%s1614_s12 + $0x8] sm:$0xff]  }
 0x227   : > { %v1346_v41 = vld [vmem:[%s1614_s12 + $0x20] sm:$0xff]  }
 0x228   : > { %v1318_v42 = vpack.c.bf16 %v580_v40, %v577_v39  ;;  %v1344_v39 = vld [vmem:[%s1614_s12 + $0x10] sm:$0xff]   ;;  %v1345_v40 = vld [vmem:[%s1614_s12 + $0x18] sm:$0xff]  }
 0x22a   : > { %661 = vrot.lane.b32.xlu0 %v1318_v42, %s1373_s15  ;;  %1319 = vmatpush3.bf16.msra.mxu1 %v1318_v42 }
 0x22b   : > { %1262 = vmatprep.subr.bf16.mxu1 %v1370_v15 }
 0x22d   : > { %1260 = vmatmul.mubr.msk.f32.vlgmr.msra.gmra.mrb[4].mxu1 %vm584_vm2, %v583_v43 }
 0x22e   : > { %1264 = vmatprep.mubr.msk.bf16.mxu1 %vm1371_vm1, %v1370_v15 }
 0x29c   : > { %v662_v44 = vpop.permute.xlu0 %661 }
 0x29d   : > { %v667_v45 = vsel %vm471_vm0, %v662_v44, 0  ;;  %v1349_v44 = vld [vmem:[%s1614_s12 + $0x38] sm:$0xff]  }
 0x29e   : > { %1263 = vmatpush3.bf16.xpose.msra.mxu1 %v667_v45  ;;  %v1203_v45 = vld [vmem:[%s1613_s11] ss:$0 sm:$0xff] }
 0x29f   : > { %1274 = vmatprep.subr.bf16.mxu1 %v1370_v15 }
 0x300   : > { %v654_v46 = vpop.f32.mrb[4].mxu1 }
 0x301   : > { %v658_v47 = vpack.c.bf16 %v654_v46, %v654_v46  ;;  %v1261_v48 = vpop.f32.mrb[5].mxu1 }
 0x303   : > { %1265 = vmatmul.mubr.msk.bf16.vlgmr.msra.gmra.mrb[8].mxu1 %vm471_vm0, %v658_v47 }
 0x304   : > { %1278 = vmatprep.mubr.msk.bf16.mxu1 %vm1371_vm1, %v1370_v15  ;;  %1275 = vmatpush3.bf16.msra.mxu1 %v1338_v60  ;;  %v1207_v60 = vld [vmem:[%s1615_s13] ss:$0 sm:$0xff] }
 0x305   : > { %1276 = vmatprep.subr.bf16.mxu1 %v1370_v15 }
 0x308   : > { %1277 = vmatpush3.bf16.msra.mxu1 %v1339_v5 }
 0x309   : > { %1289 = vmatprep.subr.bf16.mxu1 %v1370_v15 }
 0x3d6   : > { %v703_v49 = vpop.f32.mrb[8].mxu1 }
 0x3d7   : > { %v709_v50 = vmul.f32 0.17677669, %v703_v49  ;;  %v1266_v51 = vpop.f32.mrb[9].mxu1 }
 0x3d8   : > { %v706_v52 = vpop.f32.mrb[10].mxu1 }
 0x3d9   : > { %v711_v53 = vsel %vm710_vm3, %v709_v50, -inf  ;;  %v1267_v54 = vpop.f32.mrb[11].mxu1 }
 0x3da   : > { %712 = vmax.xlane.f32.xlu1 %v711_v53 }
 0x467   : > { %v713_v55 = vpop.xlane.xlu1 %712 }
 0x468   : > { %v714_v56 = vsub.f32 %v709_v50, %v713_v55 }
 0x46a   : > { %v715_v57 = vmul.f32 1.442695, %v714_v56 }
 0x46c   : > { %1354 = vpow2.f32 %v715_v57 }
 0x476   : > { %v1355_v58 = vpop.eup %1354 }
 0x477   : > { %v717_v59 = vsel %vm710_vm3, %v1355_v58, 0.0 }
 0x478   : > { %718 = vadd.xlane.f32.xlu1 %v717_v59 }
 0x489   : > { %723 = vrot.lane.b32.xlu1 %v1318_v42, %s1374_s18  ;;  %v1347_v42 = vld [vmem:[%s1614_s12 + $0x28] sm:$0xff]  }
 0x505   : > { %v719_v61 = vpop.xlane.xlu1 %718 }
 0x506   : > { %1356 = vrcp.f32 %v719_v61 }
 0x509   : > { %v724_v62 = vpop.permute.xlu1 %723 }
 0x50a   : > { %1269 = vmatpush3.bf16.msra.mxu0 %v724_v62 }
 0x50b   : > { %1320 = vmatprep.subr.bf16.mxu0 %v1372_v34 }
 0x510   : > { %v1357_v63 = vpop.eup %1356 }
 0x511   : > { %v721_v2 = vmul.f32 %v1357_v63, %v1355_v58 }
 0x513   : > { %v722_v4 = vpack.c.bf16 %v721_v2, %v721_v2 }
 0x515   : > { %1271 = vmatmul.mubr.msk.bf16.vlgmr.msra.gmra.mrb[0].mxu0 %vm584_vm2, %v722_v4 }
 0x516   : > { %1322 = vmatpush3.bf16.msra.mxu0 %v1321_v3  ;;  %1286 = vmatprep.mubr.msk.f32.mxu0 %vm1371_vm1, %v1370_v15 }
 0x517   : > { %1297 = vmatprep.subr.bf16.mxu0 %v1370_v15 }
 0x51d   : > { %1287 = vmatmul.mubr.msk.f32.vlgmr.msra.gmra.mrb[4].mxu0 %vm584_vm2, %v583_v43  ;;  %v1348_v43 = vld [vmem:[%s1614_s12 + $0x30] sm:$0xff]  }
 0x51e   : > { %1313 = vmatprep.mubr.msk.bf16.mxu0 %vm1371_vm1, %v1370_v15  ;;  %1298 = vmatpush3.bf16.msra.mxu0 %v1342_v37 }
 0x51f   : > { %1299 = vmatprep.subr.bf16.mxu0 %v1370_v15 }
 0x522   : > { %1300 = vmatpush3.bf16.msra.mxu0 %v1343_v38 }
 0x523   : > { %1301 = vmatprep.subr.bf16.mxu0 %v1370_v15 }
 0x526   : > { %1302 = vmatpush3.bf16.msra.mxu0 %v1344_v39 }
 0x527   : > { %1303 = vmatprep.subr.bf16.mxu0 %v1370_v15 }
 0x52a   : > { %1304 = vmatpush3.bf16.msra.mxu0 %v1345_v40 }
 0x52b   : > { %1305 = vmatprep.subr.bf16.mxu0 %v1370_v15 }
 0x52e   : > { %1306 = vmatpush3.bf16.msra.mxu0 %v1346_v41 }
 0x52f   : > { %1307 = vmatprep.subr.bf16.mxu0 %v1370_v15 }
 0x532   : > { %1308 = vmatpush3.bf16.msra.mxu0 %v1347_v42 }
 0x533   : > { %1309 = vmatprep.subr.bf16.mxu0 %v1370_v15 }
 0x536   : > { %1310 = vmatpush3.bf16.msra.mxu0 %v1348_v43 }
 0x537   : > { %1311 = vmatprep.subr.bf16.mxu0 %v1370_v15 }
 0x53a   : > { %1312 = vmatpush3.bf16.msra.mxu0 %v1349_v44 }
 0x5e8   : > { %v763_v0 = vpop.f32.mrb[0].mxu0 }
 0x5e9   : > { %v769_v1 = vpack.c.bf16 %v763_v0, %v763_v0  ;;  %v1272_v6 = vpop.f32.mrb[1].mxu0 }
 0x5ea   : > { %v766_v7 = vpop.f32.mrb[2].mxu0 }
 0x5eb   : > { %v1273_v8 = vpop.f32.mrb[3].mxu0  ;;  %1279 = vmatmul.mubr.msk.bf16.vlgmr.msra.gmra.mrb[12].mxu1 %vm471_vm0, %v769_v1 }
 0x5ec   : > { %1293 = vmatprep.mubr.msk.bf16.mxu1 %vm1371_vm1, %v1370_v15  ;;  %1290 = vmatpush3.bf16.msra.mxu1 %v1340_v25 }
 0x5ed   : > { %1291 = vmatprep.subr.bf16.mxu1 %v1370_v15 }
 0x5f0   : > { %v902_v9 = vpop.f32.mrb[4].mxu0  ;;  %1292 = vmatpush3.bf16.msra.mxu1 %v1341_v26 }
 0x5f1   : > { %v1288_v10 = vpop.f32.mrb[5].mxu0 }
 0x6be   : > { %v830_v12 = vpop.f32.mrb[12].mxu1 }
 0x6bf   : > { %v831_v13 = vadd.f32 %v1196_v11, %v830_v12  ;;  %v1280_v14 = vpop.f32.mrb[13].mxu1 }
 0x6c0   : > { %v833_v16 = vpop.f32.mrb[14].mxu1 }
 0x6c1   : > { %v1536_v17 = vadd.f32 %v902_v9, %v831_v13  ;;  %v1281_v18 = vpop.f32.mrb[15].mxu1 }
 0x6c3   : > { %v909_v19 = vsel %vm908_vm4, %v1536_v17, 0.0 }
 0x6c4   : > { %910 = vadd.xlane.f32.xlu0 %v909_v19 }
 0x751   : > { %v911_v20 = vpop.xlane.xlu0 %910 }
 0x752   : > { %v912_v21 = vmul.f32 0.03125, %v911_v20 }
 0x754   : > { %v913_v22 = vsub.f32 %v1536_v17, %v912_v21 }
 0x756   : > { %v914_v23 = vmul.f32 %v913_v22, %v913_v22 }
 0x758   : > { %v915_v24 = vsel %vm908_vm4, %v914_v23, 0.0 }
 0x759   : > { %916 = vadd.xlane.f32.xlu1 %v915_v24 }
 0x7e6   : > { %v917_v27 = vpop.xlane.xlu1 %916 }
 0x7e7   : > { %v918_v28 = vmul.f32 0.03125, %v917_v27 }
 0x7e9   : > { %v919_v29 = vadd.f32 1e-05, %v918_v28 }
 0x7eb   : > { %1358 = vrsqrt.f32 %v919_v29 }
 0x7f5   : > { %v1359_v30 = vpop.eup %1358 }
 0x7f6   : > { %v921_v32 = vmul.f32 %v1359_v30, %v913_v22 }
 0x7f8   : > { %v928_v34 = vmul.f32 %v1201_v31, %v921_v32 }
 0x7fa   : > { %v935_v35 = vadd.f32 %v1202_v33, %v928_v34 }
 0x7fc   : > { %v936_v36 = vpack.c.bf16 %v935_v35, %v935_v35 }
 0x7fe   : > { %1294 = vmatmul.mubr.msk.bf16.vlgmr.msra.gmra.mrb[16].mxu1 %vm471_vm0, %v936_v36 }
 0x8d1   : > { %v997_v46 = vpop.f32.mrb[16].mxu1 }
 0x8d2   : > { %v998_v47 = vadd.f32 %v1203_v45, %v997_v46  ;;  %v1295_v48 = vpop.f32.mrb[17].mxu1 }
 0x8d3   : > { %v1000_v49 = vpop.f32.mrb[18].mxu1 }
 0x8d4   : > { %v1003_v50 = vmul.f32 %v998_v47, %v998_v47  ;;  %v1296_v51 = vpop.f32.mrb[19].mxu1 }
 0x8d6   : > { %v1004_v52 = vmul.f32 %v1003_v50, %v998_v47 }
 0x8d8   : > { %v1005_v53 = vmul.f32 0.044715, %v1004_v52 }
 0x8da   : > { %v1006_v54 = vadd.f32 %v1005_v53, %v998_v47 }
 0x8dc   : > { %v1007_v55 = vmul.f32 0.7978846, %v1006_v54 }
 0x8de   : > { %1360 = vtanh.f32 %v1007_v55 }
 0x8e8   : > { %v1361_v56 = vpop.eup %1360 }
 0x8e9   : > { %v1009_v57 = vadd.f32 1.0, %v1361_v56 }
 0x8eb   : > { %v1010_v15 = vmul.f32 0.5, %v1009_v57 }
 0x8ed   : > { %v1011_v58 = vmul.f32 %v1010_v15, %v998_v47 }
 0x8ef   : > { %v1012_v59 = vpack.c.bf16 %v1011_v58, %v1011_v58 }
 0x8f1   : > { %1314 = vmatmul.mubr.bf16.vlgmr.msra.gmra.mrb[8].mxu0 %v1012_v59 }
 0x9c4   : > { %v1118_v61 = vpop.f32.mrb[8].mxu0 }
 0x9c5   : > { %v1119_v62 = vadd.f32 %v1207_v60, %v1118_v61  ;;  %v1315_v63 = vpop.f32.mrb[9].mxu0 }
 0x9c6   : > { %v1121_v2 = vpop.f32.mrb[10].mxu0 }
 0x9c7   : > { %v1124_v3 = vadd.f32 %v1119_v62, %v1536_v17  ;;  %v1316_v4 = vpop.f32.mrb[11].mxu0 }
 0x9c9   : > { %1125 = vst.msk [vmem:[%s465_s28] sm:$0xf] %vm908_vm4, %v1124_v3 }
 0x9ca PF: > { %s24_s29 = sadd.s32 1, %s1368_s29  }
 0x9cb   : > { %p21_p4 = scmp.ge.s32.totalorder %s24_s29, 4  }
 0x9cd   :  { %23 = sbr.rel (!%p21_p4) target bundleno = 1 (0x1), region = 106 }

// kernel: enhanced_mvit_forward.7
= control target key start
LH: loop header
LB: loop body
LE: loop exit
PB: predicated region body
PF: predicated region fallthrough
CT: control target
= control target key end

     0   :  { %10 = vsyncpa [#allocation3], 0  ;;  %s709_s0 = inlined_call_operand.vmem [shape: f32[2,4,64], index: 0, kind: input, shape index: {}]   ;;  %s710_s1 = inlined_call_operand.vmem [shape: f32[1,64], index: 1, kind: input, shape index: {}]   ;;  %s711_s2 = inlined_call_operand.vmem [shape: f32[1,64], index: 2, kind: input, shape index: {}]   ;;  %s712_s3 = inlined_call_operand.vmem [shape: bf16[64,10], index: 3, kind: input, shape index: {}]   ;;  %s713_s4 = inlined_call_operand.vmem [shape: f32[1,10], index: 4, kind: input, shape index: {}]   ;;  %s714_s5 = inlined_call_operand.hbm [shape: f32[2,1,10], index: 5, kind: output, shape index: {}]  }
   0x1   :  { %12 = vsyncpa [#allocation3 + $0x1], 0  ;;  %s585_s18 = smov 0   ;;  %s587_s19 = smov 0  }
   0x2   :  { %s589_s20 = smov 0   ;;  %s591_s21 = smov 0  }
   0x3 LB: > { %s606_s22 = sadd.s32 4294967295, %s550_s21   ;;  %s409_s23 = sadd.s32 4294967294, %s550_s21   ;;  %s550_s21 = sphi %s591_s21, %s720_s21   ;;  %s546_s20 = sphi %s589_s20, %s719_s20   ;;  %s542_s19 = sphi %s587_s19, %s718_s19   ;;  %s538_s18 = sphi %s585_s18, %s717_s18  }
   0x4   : > { %s610_s24 = sadd.s32 1, %s550_s21   ;;  %s135_s25 = sadd.s32 1, %s546_s20 }
   0x5   : > { %s132_s26 = ssub.s32 %s550_s21, %s610_s24  ;;  %p145_p0 = scmp.ne.s32.totalorder %s546_s20, %s542_s19 }
   0x6   : > { %p133_p1 = scmp.eq.s32.totalorder %s132_s26, 0  ;;  %p146_p2 = scmp.eq.s32.totalorder %s606_s22, 1 }
   0x7   : > { %p151_p3 = scmp.ne.s32.totalorder %s542_s19, %s538_s18  ;;  %p152_p4 = scmp.eq.s32.totalorder %s409_s23, 1 }
   0x8   : > { %s621_s27 = scalar_select %p133_p1, %s546_s20, %s135_s25  }
   0x9   : > { %p623_p5 = por %p146_p2, %p145_p0  ;;  %p627_p6 = por %p152_p4, %p151_p3 }
   0xa   : > { %p412_p7 = scmp.ge.s32.totalorder %s550_s21, 1  ;;  %p189_p8 = scmp.lt.s32.totalorder %s550_s21, 3 }
   0xc   : > { %p190_p9 = pnand %p412_p7, %p189_p8 }
   0xd   : > { %p215_p10 = scmp.lt.s32.totalorder (!%p190_p9), %s606_s22, 1  ;;  %vm223_vm0 = vcmask (!%p190_p9), 519168   ;;  %v482_v7 = vld [vmem:[%s712_s3] sm:$0xff] (!%p190_p9)   ;;  %v552_v8 = vmov (!%p190_p9), 0.0   ;;  %vm553_vm1 = vmmov (!%p190_p9), 0   ;;  %v483_v9 = vld [vmem:[%s712_s3 + $0x8] sm:$0xff] (!%p190_p9)  }
   0xe   : > { %193 = sbr.rel (%p190_p9) target bundleno = 584 (0x248), region = 40  ;;  %429 = vmatprep.subr.bf16.mxu0 (!%p190_p9), %v552_v8  ;;  %437 = vmatprep.mubr.msk.bf16.mxu0 (!%p190_p9), %vm553_vm1, %v552_v8  ;;  %v484_v10 = vld [vmem:[%s712_s3 + $0x10] sm:$0xff] (!%p190_p9)   ;;  %v485_v11 = vld [vmem:[%s712_s3 + $0x18] sm:$0xff] (!%p190_p9)   ;;  %v414_v16 = vld [vmem:[%s710_s1] ss:$0 sm:$0xff] (!%p190_p9)  ;;  %vm295_vm2 = vcmask (!%p190_p9), 523264  }
   0xf   : > { %430 = vmatpush3.bf16.msra.mxu0 (!%p190_p9), %v482_v7  ;;  %v415_v18 = vld [vmem:[%s711_s2] ss:$0 sm:$0xff] (!%p190_p9)  ;;  %vm339_vm3 = vcmask (!%p190_p9), 73728   ;;  %s554_s16 = smov (!%p190_p9), [#allocation2]  }
  0x10   : > { %431 = vmatprep.subr.bf16.mxu0 (!%p190_p9), %v552_v8  ;;  %v270_v30 = vld [vmem:[%s713_s4] sm:$0x1] (!%p190_p9)  ;;  %s492_s17 = sshll.u32 (!%p190_p9), %s554_s16, 4  ;;  %s493_s17 = int_to_ptr.vmem [resolvable:$false] %s492_s17 }
  0x11   : > { %s494_s23 = scalar_lea.vmem (!%p190_p9), %s493_s17, 32 }
  0x13   : > { %432 = vmatpush3.bf16.msra.mxu0 (!%p190_p9), %v483_v9 }
  0x14   : > { %433 = vmatprep.subr.bf16.mxu0 (!%p190_p9), %v552_v8 }
  0x15   : > { %s216_s30 = scalar_select %p215_p10, %s606_s22, 1 }
  0x17   : > { %s413_s6 = sshll.u32 %s216_s30, 2  ;;  %434 = vmatpush3.bf16.msra.mxu0 %v484_v10 }
  0x18   : > { %s218_s9 = scalar_lea.vmem %s709_s0, %s413_s6  ;;  %435 = vmatprep.subr.bf16.mxu0 %v552_v8  ;;  %s213_s6 = sand.u32 1, %s542_s19  }
  0x19   : > { %v220_v0 = vld [vmem:[%s218_s9] sm:$0xf]  ;;  %s421_s9 = sshll.u32 %s606_s22, 4  ;;  %s214_s10 = scalar_lea.vmem [#allocation2], %s213_s6 }
  0x1a   : > { %v224_v1 = vsel %vm223_vm0, %v220_v0, 0.0  ;;  %s354_s11 = sshll.u32 %s214_s10, 4  ;;  %s667_s14 = scalar_lea.hbm %s714_s5, %s421_s9  ;;  %s669_s11 = int_to_ptr.vmem [resolvable:$true] %s354_s11 }
  0x1b   : > { %225 = vadd.xlane.f32.xlu0 %v224_v1  ;;  %436 = vmatpush3.bf16.msra.mxu0 %v485_v11  ;;  %s342_s22 = scalar_lea.sflag [#allocation3], %s213_s6  ;;  %s488_s15 = scalar_lea.vmem %s669_s11, 16 }
  0x1c   : > { %p489_p11 = scmp.ne.s32.totalorder %s669_s11, %s488_s15  ;;  %p495_p0 = scmp.lt.s32.totalorder %s669_s11, %s493_s17 }
  0x1d   : > { %p496_p1 = scmp.lt.s32.totalorder %s494_s23, %s488_s15 }
  0x1e   : > { %p490_p12 = pnand %p489_p11, %p623_p5 }
  0x1f   : > { %p497_p2 = por %p496_p1, %p495_p0 }
  0x20   : > { %p491_p13 = pneg %p490_p12 }
  0x22   : > { %p498_p3 = pnand %p497_p2, %p491_p13 }
  0xa8   : > { %v226_v2 = vpop.xlane.xlu0 %225 }
  0xa9   : > { %v228_v3 = vmul.f32 0.015625, %v226_v2 }
  0xab   : > { %v229_v4 = vsub.f32 %v220_v0, %v228_v3 }
  0xad   : > { %v230_v5 = vmul.f32 %v229_v4, %v229_v4 }
  0xaf   : > { %v231_v6 = vsel %vm223_vm0, %v230_v5, 0.0 }
  0xb0   : > { %232 = vadd.xlane.f32.xlu0 %v231_v6 }
 0x13d   : > { %v233_v12 = vpop.xlane.xlu0 %232 }
 0x13e   : > { %v234_v13 = vmul.f32 0.015625, %v233_v12 }
 0x140   : > { %v235_v14 = vadd.f32 1e-05, %v234_v13 }
 0x142   : > { %486 = vrsqrt.f32 %v235_v14 }
 0x14c   : > { %v487_v15 = vpop.eup %486 }
 0x14d   : > { %v237_v17 = vmul.f32 %v487_v15, %v229_v4 }
 0x14f   : > { %v244_v19 = vmul.f32 %v414_v16, %v237_v17 }
 0x151   : > { %v251_v20 = vadd.f32 %v415_v18, %v244_v19 }
 0x153   : > { %v252_v21 = vsel %vm223_vm0, %v251_v20, 0.0 }
 0x154   : > { %v253_v22 = vrot.slane %v252_v21, 4 }
 0x156   : > { %v254_v23 = vadd.f32 %v253_v22, %v252_v21 }
 0x158   : > { %v255_v24 = vrot.slane %v254_v23, 2 }
 0x15a   : > { %v256_v25 = vadd.f32 %v255_v24, %v254_v23 }
 0x15c   : > { %v257_v26 = vrot.slane %v256_v25, 1 }
 0x15e   : > { %v258_v27 = vadd.f32 %v257_v26, %v256_v25 }
 0x160   : > { %v260_v28 = vmul.f32 0.25, %v258_v27 }
 0x162   : > { %v261_v29 = vpack.c.bf16 %v260_v28, %v260_v28 }
 0x164   : > { %438 = vmatmul.mubr.msk.bf16.vlgmr.msra.gmra.mrb[0].mxu0 %vm295_vm2, %v261_v29 }
 0x237   : > { %v333_v31 = vpop.f32.mrb[0].mxu0 }
 0x238   : > { %v334_v32 = vadd.f32 %v333_v31, %v270_v30  ;;  %v439_v33 = vpop.f32.mrb[1].mxu0 }
 0x239   : > { %v336_v34 = vpop.f32.mrb[2].mxu0 }
 0x23a   : > { %v440_v35 = vpop.f32.mrb[3].mxu0  ;;  %340 = vst.msk [vmem:[%s214_s10] sm:$0x1] %vm339_vm3, %v334_v32 }
 0x23b   : > { %501 = shalt.err (!%p498_p3)
}
 0x23c   : > { %s502_s25 = scalar_lea.hbm %s667_s14, 16  ;;  %s506_s6 = scalar_lea.hbm %s714_s5, 32 }
 0x23d   : > { %p503_p4 = scmp.ne.s32.totalorder %s667_s14, %s502_s25  ;;  %p507_p9 = scmp.lt.u32.totalorder %s667_s14, %s714_s5 }
 0x23e   : > { %p508_p10 = scmp.lt.u32.totalorder %s506_s6, %s502_s25  ;;  %p510_p12 = scmp.lt.u32.totalorder %s502_s25, %s667_s14 }
 0x23f   : > { %p504_p7 = pnand %p503_p4, %p623_p5 }
 0x240   : > { %p509_p11 = por %p508_p10, %p507_p9 }
 0x241   : > { %p505_p8 = pneg %p504_p7 }
 0x242   : > { %p511_p13 = por %p510_p12, %p509_p11 }
 0x244   : > { %p512_p0 = pnand %p511_p13, %p505_p8 }
 0x246   : > { %515 = shalt.err (!%p512_p0)
}
 0x247   : > { %441 = dma.vmem_to_hbm [thread:$0]  (%p623_p5), %s669_s11, 16, %s667_s14, %s342_s22  }
 0x248 PF: > { %p447_p1 = scmp.ge.s32.totalorder %s550_s21, 2  ;;  %s366_s9 = sand.u32 1, %s538_s18  }
 0x249   : > { %s367_s10 = scalar_lea.sflag [#allocation3], %s366_s9 }
 0x24a   : > { %p444_p2 = pnand %p447_p1, %p627_p6 }
 0x24c   : > { %533 = dma.done.wait (!%p444_p2), %s367_s10, 16  }
 0x24d   : > { %535 = vsyncadd (!%p444_p2), %s367_s10, 4294967280  ;;  %p15_p3 = scmp.ge.s32.totalorder %s610_s24, 4   ;;  %s717_s18 = smov %s542_s19 }
 0x24e   : > { %s718_s19 = smov %s546_s20  ;;  %s719_s20 = smov %s621_s27 }
 0x24f   : > { %s720_s21 = smov %s610_s24  ;;  %17 = sbr.rel (!%p15_p3) target bundleno = 3 (0x3), region = 75 }
 0x256   :  { %371 = vsyncpa [#allocation3], 1 }
 0x257   :  { %373 = vsyncpa [#allocation3 + $0x1], 1 }

// kernel: enhanced_mvit_forward.6
= control target key start
LH: loop header
LB: loop body
LE: loop exit
PB: predicated region body
PF: predicated region fallthrough
CT: control target
= control target key end

     0   :  { %s1521_s18 = smov 0   ;;  %s1692_s0 = inlined_call_operand.vmem [shape: f32[2,4,32], index: 0, kind: input, shape index: {}]   ;;  %s1693_s1 = inlined_call_operand.vmem [shape: f32[1,32], index: 1, kind: input, shape index: {}]   ;;  %s1694_s2 = inlined_call_operand.vmem [shape: f32[1,32], index: 2, kind: input, shape index: {}]   ;;  %s1695_s3 = inlined_call_operand.vmem [shape: bf16[32,96], index: 3, kind: input, shape index: {}]   ;;  %s1696_s4 = inlined_call_operand.vmem [shape: f32[1,96], index: 4, kind: input, shape index: {}]   ;;  %s1697_s5 = inlined_call_operand.vmem [shape: bf16[32,32], index: 5, kind: input, shape index: {}]   ;;  %s1698_s6 = inlined_call_operand.vmem [shape: f32[1,32], index: 6, kind: input, shape index: {}]   ;;  %s1699_s7 = inlined_call_operand.vmem [shape: f32[1,32], index: 7, kind: input, shape index: {}]   ;;  %s1700_s8 = inlined_call_operand.vmem [shape: f32[1,32], index: 8, kind: input, shape index: {}]   ;;  %s1701_s9 = inlined_call_operand.vmem [shape: bf16[32,128], index: 9, kind: input, shape index: {}]   ;;  %s1702_s10 = inlined_call_operand.vmem [shape: f32[1,128], index: 10, kind: input, shape index: {}]   ;;  %s1703_s11 = inlined_call_operand.vmem [shape: bf16[128,64], index: 11, kind: input, shape index: {}]   ;;  %s1704_s12 = inlined_call_operand.vmem [shape: f32[1,64], index: 12, kind: input, shape index: {}]   ;;  %s1705_s13 = inlined_call_operand.vmem [shape: bf16[32,64], index: 13, kind: input, shape index: {}]   ;;  %s1706_s14 = inlined_call_operand.vmem [shape: f32[1,64], index: 14, kind: input, shape index: {}]   ;;  %s1707_s15 = inlined_call_operand.vmem [shape: f32[2,4,64], index: 15, kind: output, shape index: {}]  }
   0x1 LB: > { %s1226_s19 = sadd.s32 4294967295, %s1431_s18   ;;  %p1230_p0 = scmp.ge.s32.totalorder %s1431_s18, 1  ;;  %s1431_s18 = sphi %s1521_s18, %s25_s18  }
   0x2   : > { %p436_p1 = scmp.lt.s32.totalorder %s1431_s18, 3 }
   0x4   : > { %p437_p2 = pnand %p1230_p0, %p436_p1 }
   0x5   : > { %p482_p3 = scmp.lt.s32.totalorder (!%p437_p2), %s1226_s19, 1  ;;  %vm494_vm0 = vcmask (!%p437_p2), 257024   ;;  %v1395_v7 = vld [vmem:[%s1695_s3] sm:$0xff] (!%p437_p2)   ;;  %v1433_v8 = vmov (!%p437_p2), 0.0   ;;  %vm1434_vm1 = vmmov (!%p437_p2), 0   ;;  %v1396_v9 = vld [vmem:[%s1695_s3 + $0x8] sm:$0xff] (!%p437_p2)  }
   0x6   : > { %440 = sbr.rel (%p437_p2) target bundleno = 3070 (0xbfe), region = 80  ;;  %1297 = vmatprep.subr.bf16.mxu0 (!%p437_p2), %v1433_v8  ;;  %1301 = vmatprep.mubr.msk.bf16.mxu0 (!%p437_p2), %vm1434_vm1, %v1433_v8  ;;  %v1233_v14 = vld [vmem:[%s1693_s1] ss:$0 sm:$0xff] (!%p437_p2)  ;;  %vm547_vm2 = vcmask (!%p437_p2), 261120   ;;  %s1435_s22 = smov (!%p437_p2), 64   ;;  %vm595_vm3 = vcmask (!%p437_p2), 130048  }
   0x7   : > { %1298 = vmatpush3.bf16.msra.mxu0 (!%p437_p2), %v1395_v7  ;;  %1329 = vmatprep.subr.bf16.mxu1 (!%p437_p2), %v1433_v8  ;;  %v1234_v16 = vld [vmem:[%s1694_s2] ss:$0 sm:$0xff] (!%p437_p2)  ;;  %vm662_vm4 = vcmask (!%p437_p2), 1041408   ;;  %vm643_vm5 = vcmask (!%p437_p2), 27648   ;;  %s1437_s24 = smov (!%p437_p2), 80   ;;  %s1438_s25 = smov (!%p437_p2), 112  }
   0x8   : > { %1299 = vmatprep.subr.bf16.mxu0 (!%p437_p2), %v1433_v8  ;;  %1333 = vmatprep.mubr.msk.bf16.mxu1 (!%p437_p2), %vm1434_vm1, %v1433_v8  ;;  %v1235_v20 = vld [vmem:[%s1696_s4] ss:$0 sm:$0xff] (!%p437_p2)  ;;  %vm658_vm6 = vcmask (!%p437_p2), 31744   ;;  %s1439_s26 = smov (!%p437_p2), 48   ;;  %s1440_s16 = smov (!%p437_p2), 16   ;;  %vm1171_vm7 = vcmask (!%p437_p2), 519168  }
   0x9   : > { %v1397_v7 = vld [vmem:[%s1697_s5] sm:$0xff] (!%p437_p2)  }
   0xa   : > { %1330 = vmatpush3.bf16.msra.mxu1 (!%p437_p2), %v1397_v7 }
   0xb   : > { %1300 = vmatpush3.bf16.msra.mxu0 (!%p437_p2), %v1396_v9  ;;  %1331 = vmatprep.subr.bf16.mxu1 (!%p437_p2), %v1433_v8  ;;  %v1398_v9 = vld [vmem:[%s1697_s5 + $0x8] sm:$0xff] (!%p437_p2)  }
   0xc   : > { %1305 = vmatprep.subr.bf16.mxu0 (!%p437_p2), %v1433_v8 }
   0xd   : > { %s1709_s19 = smov (!%p482_p3, %s1226_s19), 1 }
   0xe   : > { %s1231_s20 = sshll.u32 %s1709_s19, 2  ;;  %1332 = vmatpush3.bf16.msra.mxu1 %v1398_v9 }
   0xf   : > { %s485_s23 = scalar_lea.vmem %s1692_s0, %s1231_s20  ;;  %1345 = vmatprep.subr.bf16.mxu1 %v1433_v8 }
  0x10   : > { %v1537_v0 = vld [vmem:[%s485_s23] sm:$0xf]  ;;  %s1436_s23 = smov 96  }
  0x11   : > { %v495_v1 = vsel %vm494_vm0, %v1537_v0, 0.0 }
  0x12   : > { %496 = vadd.xlane.f32.xlu0 %v495_v1 }
  0x9f   : > { %v497_v2 = vpop.xlane.xlu0 %496 }
  0xa0   : > { %v499_v3 = vmul.f32 0.03125, %v497_v2 }
  0xa2   : > { %v500_v4 = vsub.f32 %v1537_v0, %v499_v3 }
  0xa4   : > { %v501_v5 = vmul.f32 %v500_v4, %v500_v4 }
  0xa6   : > { %v502_v6 = vsel %vm494_vm0, %v501_v5, 0.0 }
  0xa7   : > { %503 = vadd.xlane.f32.xlu0 %v502_v6 }
 0x134   : > { %v504_v10 = vpop.xlane.xlu0 %503 }
 0x135   : > { %v505_v11 = vmul.f32 0.03125, %v504_v10 }
 0x137   : > { %v506_v12 = vadd.f32 1e-05, %v505_v11 }
 0x139   : > { %1411 = vrsqrt.f32 %v506_v12 }
 0x143   : > { %v1412_v13 = vpop.eup %1411 }
 0x144   : > { %v508_v15 = vmul.f32 %v1412_v13, %v500_v4 }
 0x146   : > { %v515_v17 = vmul.f32 %v1233_v14, %v508_v15 }
 0x148   : > { %v522_v18 = vadd.f32 %v1234_v16, %v515_v17  ;;  %v1243_v17 = vld [vmem:[%s1698_s6] ss:$0 sm:$0xff] }
 0x14a   : > { %v523_v19 = vpack.c.bf16 %v522_v18, %v522_v18 }
 0x14c   : > { %1302 = vmatmul.mubr.msk.bf16.vlgmr.msra.gmra.mrb[0].mxu0 %vm547_vm2, %v523_v19 }
 0x14d   : > { %1307 = vmatprep.mubr.msk.bf16.mxu0 %vm1434_vm1, %v1433_v8 }
 0x21f   : > { %v585_v21 = vpop.f32.mrb[0].mxu0 }
 0x220   : > { %v586_v22 = vadd.f32 %v1235_v20, %v585_v21  ;;  %v1303_v23 = vpop.f32.mrb[1].mxu0 }
 0x221   : > { %v588_v24 = vpop.f32.mrb[2].mxu0 }
 0x222   : > { %v1569_v25 = vpack.c.bf16 %v586_v22, %v586_v22  ;;  %v1304_v26 = vpop.f32.mrb[3].mxu0 }
 0x224   : > { %656 = vrot.lane.b32.xlu0 %v1569_v25, %s1435_s22  ;;  %593 = vrot.lane.b32.xlu1 %v1569_v25, %s1436_s23  ;;  %s489_s22 = scalar_lea.vmem %s1707_s15, %s1231_s20 }
 0x296   : > { %v594_v27 = vpop.permute.xlu1 %593  ;;  %v657_v29 = vpop.permute.xlu0 %656 }
 0x297   : > { %v600_v28 = vsel %vm595_vm3, %v594_v27, 0  ;;  %v664_v30 = vsel %vm662_vm4, %v657_v29, 0 }
 0x298   : > { %1306 = vmatpush3.bf16.xpose.msra.mxu0 %v600_v28 }
 0x299   : > { %1311 = vmatprep.subr.bf16.mxu0 %v1433_v8 }
 0x29f   : > { %1308 = vmatmul.mubr.msk.bf16.vlgmr.msra.gmra.mrb[4].mxu0 %vm595_vm3, %v1569_v25 }
 0x2a0   : > { %1312 = vmatpush3.bf16.msra.mxu0 %v664_v30  ;;  %1313 = vmatprep.mubr.msk.bf16.mxu0 %vm1434_vm1, %v1433_v8  ;;  %v1399_v30 = vld [vmem:[%s1701_s9] sm:$0xff]  }
 0x2a1   : > { %1317 = vmatprep.subr.bf16.mxu0 %v1433_v8 }
 0x372   : > { %v636_v31 = vpop.f32.mrb[4].mxu0 }
 0x373   : > { %v642_v32 = vmul.f32 0.25, %v636_v31  ;;  %v1309_v33 = vpop.f32.mrb[5].mxu0  ;;  %v1400_v31 = vld [vmem:[%s1701_s9 + $0x8] sm:$0xff]  }
 0x374   : > { %v639_v34 = vpop.f32.mrb[6].mxu0 }
 0x375   : > { %v1310_v35 = vpop.f32.mrb[7].mxu0  ;;  %v644_v36 = vsel %vm643_vm5, %v642_v32, -inf }
 0x376   : > { %645 = vmax.xlane.f32.xlu1 %v644_v36  ;;  %v1247_v35 = vld [vmem:[%s1699_s7] ss:$0 sm:$0xff] }
 0x403   : > { %v646_v37 = vpop.xlane.xlu1 %645 }
 0x404   : > { %v647_v38 = vsub.f32 %v642_v32, %v646_v37  ;;  %v1248_v37 = vld [vmem:[%s1700_s8] ss:$0 sm:$0xff] }
 0x406   : > { %v648_v39 = vmul.f32 1.442695, %v647_v38 }
 0x408   : > { %1413 = vpow2.f32 %v648_v39 }
 0x412   : > { %v1414_v40 = vpop.eup %1413 }
 0x413   : > { %v650_v41 = vsel %vm643_vm5, %v1414_v40, 0.0 }
 0x414   : > { %651 = vadd.xlane.f32.xlu0 %v650_v41  ;;  %v1401_v41 = vld [vmem:[%s1703_s11] sm:$0xff]  }
 0x42a   : > { %708 = vrot.lane.b32.xlu0 %v1569_v25, %s1437_s24 }
 0x42e   : > { %706 = vrot.lane.b32.xlu0 %v1569_v25, %s1438_s25 }
 0x4a1   : > { %v652_v42 = vpop.xlane.xlu0 %651 }
 0x4a2   : > { %1415 = vrcp.f32 %v652_v42  ;;  %v1402_v42 = vld [vmem:[%s1703_s11 + $0x8] sm:$0xff]  }
 0x4a5   : > { %v709_v45 = vpop.permute.xlu0 %708 }
 0x4a6   : > { %v714_v47 = vsel %vm595_vm3, %v709_v45, 0  ;;  %v1405_v45 = vld [vmem:[%s1703_s11 + $0x20] sm:$0xff]  }
 0x4a9   : > { %v707_v48 = vpop.permute.xlu0 %706 }
 0x4ac   : > { %v1416_v43 = vpop.eup %1415 }
 0x4ad   : > { %v654_v44 = vmul.f32 %v1416_v43, %v1414_v40  ;;  %v1403_v43 = vld [vmem:[%s1703_s11 + $0x10] sm:$0xff]  }
 0x4af   : > { %v655_v46 = vpack.c.bf16 %v654_v44, %v654_v44  ;;  %v1404_v44 = vld [vmem:[%s1703_s11 + $0x18] sm:$0xff]  }
 0x4b1   : > { %1314 = vmatmul.mubr.msk.bf16.vlgmr.msra.gmra.mrb[8].mxu0 %vm658_vm6, %v655_v46  ;;  %v1406_v46 = vld [vmem:[%s1703_s11 + $0x28] sm:$0xff]  }
 0x4b2   : > { %1318 = vmatpush3.bf16.xpose.msra.mxu0 %v714_v47  ;;  %1319 = vmatprep.mubr.msk.bf16.mxu0 %vm1434_vm1, %v1433_v8  ;;  %v1407_v47 = vld [vmem:[%s1703_s11 + $0x30] sm:$0xff]  }
 0x4b3   : > { %1323 = vmatprep.subr.bf16.mxu0 %v1433_v8 }
 0x4b9   : > { %1320 = vmatmul.mubr.msk.bf16.vlgmr.msra.gmra.mrb[12].mxu0 %vm595_vm3, %v707_v48  ;;  %v1408_v48 = vld [vmem:[%s1703_s11 + $0x38] sm:$0xff]  }
 0x4ba   : > { %1325 = vmatprep.mubr.msk.bf16.mxu0 %vm1434_vm1, %v1433_v8 }
 0x584   : > { %v700_v49 = vpop.f32.mrb[8].mxu0 }
 0x585   : > { %v1315_v50 = vpop.f32.mrb[9].mxu0 }
 0x586   : > { %v703_v51 = vpop.f32.mrb[10].mxu0 }
 0x587   : > { %v1316_v52 = vpop.f32.mrb[11].mxu0 }
 0x58c   : > { %v750_v53 = vpop.f32.mrb[12].mxu0 }
 0x58d   : > { %v756_v54 = vmul.f32 0.25, %v750_v53  ;;  %v1321_v55 = vpop.f32.mrb[13].mxu0 }
 0x58e   : > { %v753_v56 = vpop.f32.mrb[14].mxu0 }
 0x58f   : > { %v1322_v57 = vpop.f32.mrb[15].mxu0  ;;  %v757_v58 = vsel %vm643_vm5, %v756_v54, -inf }
 0x590   : > { %758 = vmax.xlane.f32.xlu1 %v757_v58 }
 0x5a1   : > { %769 = vrot.lane.b32.xlu1 %v1569_v25, %s1439_s26 }
 0x61d   : > { %v759_v59 = vpop.xlane.xlu1 %758 }
 0x61e   : > { %v760_v60 = vsub.f32 %v756_v54, %v759_v59 }
 0x620   : > { %v761_v61 = vmul.f32 1.442695, %v760_v60 }
 0x621   : > { %v770_v62 = vpop.permute.xlu1 %769 }
 0x622   : > { %1417 = vpow2.f32 %v761_v61  ;;  %v775_v63 = vsel %vm662_vm4, %v770_v62, 0 }
 0x623   : > { %1324 = vmatpush3.bf16.msra.mxu0 %v775_v63 }
 0x624   : > { %1337 = vmatprep.subr.bf16.mxu0 %v1433_v8 }
 0x62c   : > { %v1418_v1 = vpop.eup %1417 }
 0x62d   : > { %v763_v2 = vsel %vm643_vm5, %v1418_v1, 0.0 }
 0x62e   : > { %764 = vadd.xlane.f32.xlu0 %v763_v2 }
 0x6bb   : > { %v765_v3 = vpop.xlane.xlu0 %764 }
 0x6bc   : > { %1419 = vrcp.f32 %v765_v3  ;;  %v1410_v3 = vld [vmem:[%s1705_s13 + $0x8] sm:$0xff]  }
 0x6c6   : > { %v1420_v4 = vpop.eup %1419 }
 0x6c7   : > { %v767_v5 = vmul.f32 %v1420_v4, %v1418_v1  ;;  %v1409_v1 = vld [vmem:[%s1705_s13] sm:$0xff]  }
 0x6c8   : > { %v1253_v4 = vld [vmem:[%s1704_s12] ss:$0 sm:$0xff] }
 0x6c9   : > { %v768_v6 = vpack.c.bf16 %v767_v5, %v767_v5  ;;  %v1262_v5 = vld [vmem:[%s1706_s14] ss:$0 sm:$0xff] }
 0x6cb   : > { %1326 = vmatmul.mubr.msk.bf16.vlgmr.msra.gmra.mrb[16].mxu0 %vm658_vm6, %v768_v6  ;;  %v1373_v6 = vadd.f32 %v1262_v5, %v1253_v4 }
 0x6cc   : > { %1341 = vmatprep.mubr.msk.bf16.mxu0 %vm1434_vm1, %v1433_v8  ;;  %1338 = vmatpush3.bf16.msra.mxu0 %v1399_v30 }
 0x6cd   : > { %1339 = vmatprep.subr.bf16.mxu0 %v1433_v8 }
 0x6d0   : > { %1340 = vmatpush3.bf16.msra.mxu0 %v1400_v31 }
 0x79e   : > { %v811_v10 = vpop.f32.mrb[16].mxu0 }
 0x79f   : > { %818 = vrot.lane.b32.xlu1 %v811_v10, %s1440_s16  ;;  %v1327_v11 = vpop.f32.mrb[17].mxu0 }
 0x7a0   : > { %v814_v12 = vpop.f32.mrb[18].mxu0 }
 0x7a1   : > { %v1328_v13 = vpop.f32.mrb[19].mxu0 }
 0x811   : > { %v819_v14 = vpop.permute.xlu1 %818 }
 0x812   : > { %v821_v15 = vsel %vm595_vm3, %v700_v49, %v819_v14  ;;  %v1249_v49 = vld [vmem:[%s1702_s10] ss:$0 sm:$0xff] }
 0x813   : > { %v822_v16 = vpack.c.bf16 %v821_v15, %v821_v15 }
 0x815   : > { %1334 = vmatmul.mubr.msk.bf16.vlgmr.msra.gmra.mrb[0].mxu1 %vm547_vm2, %v822_v16 }
 0x816   : > { %1361 = vmatprep.mubr.msk.bf16.mxu1 %vm1434_vm1, %v1433_v8  ;;  %1346 = vmatpush3.bf16.msra.mxu1 %v1401_v41 }
 0x817   : > { %1347 = vmatprep.subr.bf16.mxu1 %v1433_v8 }
 0x81a   : > { %1348 = vmatpush3.bf16.msra.mxu1 %v1402_v42 }
 0x81b   : > { %1349 = vmatprep.subr.bf16.mxu1 %v1433_v8 }
 0x81e   : > { %1350 = vmatpush3.bf16.msra.mxu1 %v1403_v43 }
 0x81f   : > { %1351 = vmatprep.subr.bf16.mxu1 %v1433_v8 }
 0x822   : > { %1352 = vmatpush3.bf16.msra.mxu1 %v1404_v44 }
 0x823   : > { %1353 = vmatprep.subr.bf16.mxu1 %v1433_v8 }
 0x826   : > { %1354 = vmatpush3.bf16.msra.mxu1 %v1405_v45 }
 0x827   : > { %1355 = vmatprep.subr.bf16.mxu1 %v1433_v8 }
 0x82a   : > { %1356 = vmatpush3.bf16.msra.mxu1 %v1406_v46 }
 0x82b   : > { %1357 = vmatprep.subr.bf16.mxu1 %v1433_v8 }
 0x82e   : > { %1358 = vmatpush3.bf16.msra.mxu1 %v1407_v47 }
 0x82f   : > { %1359 = vmatprep.subr.bf16.mxu1 %v1433_v8 }
 0x832   : > { %1360 = vmatpush3.bf16.msra.mxu1 %v1408_v48 }
 0x833   : > { %1365 = vmatprep.subr.bf16.mxu1 %v1433_v8 }
 0x8e8   : > { %v883_v18 = vpop.f32.mrb[0].mxu1 }
 0x8e9   : > { %v884_v19 = vadd.f32 %v1243_v17, %v883_v18  ;;  %v1335_v20 = vpop.f32.mrb[1].mxu1 }
 0x8ea   : > { %v886_v21 = vpop.f32.mrb[2].mxu1 }
 0x8eb   : > { %v1336_v22 = vpop.f32.mrb[3].mxu1  ;;  %v889_v23 = vadd.f32 %v884_v19, %v1537_v0 }
 0x8ed   : > { %v892_v24 = vsel %vm494_vm0, %v889_v23, 0.0 }
 0x8ee   : > { %893 = vadd.xlane.f32.xlu1 %v892_v24 }
 0x97b   : > { %v894_v25 = vpop.xlane.xlu1 %893 }
 0x97c   : > { %v895_v26 = vmul.f32 0.03125, %v894_v25 }
 0x97e   : > { %v896_v27 = vsub.f32 %v889_v23, %v895_v26 }
 0x980   : > { %v897_v28 = vmul.f32 %v896_v27, %v896_v27 }
 0x982   : > { %v898_v29 = vsel %vm494_vm0, %v897_v28, 0.0 }
 0x983   : > { %899 = vadd.xlane.f32.xlu0 %v898_v29 }
 0xa10   : > { %v900_v0 = vpop.xlane.xlu0 %899 }
 0xa11   : > { %v901_v32 = vmul.f32 0.03125, %v900_v0 }
 0xa13   : > { %v902_v33 = vadd.f32 1e-05, %v901_v32 }
 0xa15   : > { %1421 = vrsqrt.f32 %v902_v33 }
 0xa1f   : > { %v1422_v34 = vpop.eup %1421 }
 0xa20   : > { %v904_v36 = vmul.f32 %v1422_v34, %v896_v27 }
 0xa22   : > { %v911_v38 = vmul.f32 %v1247_v35, %v904_v36 }
 0xa24   : > { %v918_v39 = vadd.f32 %v1248_v37, %v911_v38 }
 0xa26   : > { %v919_v40 = vpack.c.bf16 %v918_v39, %v918_v39 }
 0xa28   : > { %1342 = vmatmul.mubr.msk.bf16.vlgmr.msra.gmra.mrb[20].mxu0 %vm547_vm2, %v919_v40 }
 0xafb   : > { %v980_v50 = vpop.f32.mrb[20].mxu0 }
 0xafc   : > { %v981_v51 = vadd.f32 %v1249_v49, %v980_v50  ;;  %v1343_v52 = vpop.f32.mrb[21].mxu0 }
 0xafd   : > { %v983_v53 = vpop.f32.mrb[22].mxu0 }
 0xafe   : > { %v986_v54 = vmul.f32 %v981_v51, %v981_v51  ;;  %v1344_v55 = vpop.f32.mrb[23].mxu0 }
 0xb00   : > { %v987_v56 = vmul.f32 %v986_v54, %v981_v51 }
 0xb02   : > { %v988_v57 = vmul.f32 0.044715, %v987_v56 }
 0xb04   : > { %v989_v58 = vadd.f32 %v988_v57, %v981_v51 }
 0xb06   : > { %v990_v59 = vmul.f32 0.7978846, %v989_v58 }
 0xb08   : > { %1423 = vtanh.f32 %v990_v59 }
 0xb12   : > { %v1424_v60 = vpop.eup %1423 }
 0xb13   : > { %v992_v61 = vadd.f32 1.0, %v1424_v60 }
 0xb15   : > { %v993_v62 = vmul.f32 0.5, %v992_v61 }
 0xb17   : > { %v994_v63 = vmul.f32 %v993_v62, %v981_v51 }
 0xb19   : > { %v995_v2 = vpack.c.bf16 %v994_v63, %v994_v63 }
 0xb1b   : > { %1362 = vmatmul.mubr.bf16.vlgmr.msra.gmra.mrb[4].mxu1 %v995_v2 }
 0xb1c   : > { %1366 = vmatpush3.bf16.msra.mxu1 %v1409_v1  ;;  %1369 = vmatprep.mubr.msk.bf16.mxu1 %vm1434_vm1, %v1433_v8 }
 0xb1d   : > { %1367 = vmatprep.subr.bf16.mxu1 %v1433_v8 }
 0xb20   : > { %1368 = vmatpush3.bf16.msra.mxu1 %v1410_v3 }
 0xb27   : > { %1370 = vmatmul.mubr.msk.bf16.vlgmr.msra.gmra.mrb[4].mxu1 %vm547_vm2, %v919_v40 }
 0xbfa   : > { %v1164_v7 = vpop.f32.mrb[4].mxu1 }
 0xbfb   : > { %v1374_v8 = vadd.f32 %v1373_v6, %v1164_v7  ;;  %v1371_v9 = vpop.f32.mrb[5].mxu1 }
 0xbfc   : > { %v1167_v10 = vpop.f32.mrb[6].mxu1 }
 0xbfd   : > { %1172 = vst.msk [vmem:[%s489_s22] sm:$0xf] %vm1171_vm7, %v1374_v8  ;;  %v1372_v11 = vpop.f32.mrb[7].mxu1 }
 0xbfe PF: > { %s25_s18 = sadd.s32 1, %s1431_s18  }
 0xbff   : > { %p22_p4 = scmp.ge.s32.totalorder %s25_s18, 4  }
 0xc01   :  { %24 = sbr.rel (!%p22_p4) target bundleno = 1 (0x1), region = 110 }

</bundles_post_ra>
